<compile_context>
chip_gen: v5e
topology: v5e:2x2
jax: 0.10.0
libtpu: 0.0.40
codegen_flags: <defaults>
</compile_context>

<pallas_src>
import math

import jax
import jax.numpy as jnp
from jax import lax
from jax.experimental import pallas as pl
from jax.experimental.pallas import tpu as pltpu


# ----------------------------------------------------------------------------
# helpers
# ----------------------------------------------------------------------------
def _round_up(x, m):
    return ((x + m - 1) // m) * m


def _pick_batch_tile(b_pad, target=256):
    """Largest multiple-of-8 divisor of b_pad that is <= target."""
    if b_pad <= target:
        return b_pad
    for cand in range(target, 7, -8):
        if b_pad % cand == 0:
            return cand
    return 8


def _pick_time_chunk(t, target=64):
    """Largest divisor of t that is <= target (xproj scratch chunking)."""
    if t <= target:
        return t
    for cand in range(target, 0, -1):
        if t % cand == 0:
            return cand
    return t


# ----------------------------------------------------------------------------
# Fused Pallas kernel: N-layer LSTM stack + merged loc/scale heads
# ----------------------------------------------------------------------------
def _make_fused_kernel(T, B_tile, Din, H, N, d_out, out_pad, Ts, chunk, eps,
                       mxu_dtype):
    n_hbuf = min(N, 2)
    n_chunks = T // chunk
    U = math.gcd(chunk, 8)          # sub-steps unrolled inside each fori body
    n_inner = chunk // U

    def kernel(*refs):
        # ---- unpack refs: inputs, output, scratch --------------------------
        x_ref = refs[0]                                   # (T, B_tile, Din)
        wih = [refs[1 + 3 * l] for l in range(N)]         # (Din_l, 4H) mxu dt
        whh = [refs[2 + 3 * l] for l in range(N)]         # (H, 4H)     mxu dt
        bia = [refs[3 + 3 * l] for l in range(N)]         # (1, 4H)     f32
        wh_ref = refs[1 + 3 * N]                          # (H*N, out_pad)
        bh_ref = refs[2 + 3 * N]                          # (1, out_pad)
        out_ref = refs[3 + 3 * N]                         # (Ts, B_tile, out_pad)
        xproj_sc = refs[4 + 3 * N]                        # (chunk*B_tile, 4H) f32
        hbufs = [refs[5 + 3 * N + i] for i in range(n_hbuf)]  # (T*B_tile, H) f32
        head_sc = refs[5 + 3 * N + n_hbuf]                # (Ts*B_tile, out_pad)

        for l in range(N):
            w_in = wih[l][...]           # stays resident for the whole layer
            w_rec = whh[l][...]
            b = bia[l][...]
            dst = hbufs[l % n_hbuf]
            src = None if l == 0 else hbufs[(l - 1) % n_hbuf]

            # h/c carried as register values (no per-step VMEM scratch traffic)
            h = jnp.zeros((B_tile, H), jnp.float32)
            c = jnp.zeros((B_tile, H), jnp.float32)

            for ci in range(n_chunks):
                row0 = ci * chunk * B_tile
                # ---- hoisted input projection for this T-chunk -------------
                if l == 0:
                    xc = x_ref[pl.ds(ci * chunk, chunk)]   # (chunk, B_tile, Din)
                    x2 = xc.reshape(chunk * B_tile, Din)
                else:
                    x2 = src[pl.ds(row0, chunk * B_tile), :]
                xproj_sc[...] = (
                    jnp.dot(x2.astype(mxu_dtype), w_in,
                            preferred_element_type=jnp.float32) + b)

                def chunk_body(i, carry, _row0=row0, _dst=dst, _w_rec=w_rec):
                    h_p, c_p = carry
                    for u in range(U):       # manual unroll: bounded live range
                        off = i * (U * B_tile) + u * B_tile
                        r_loc = pl.multiple_of(off, 8)
                        gates = xproj_sc[pl.ds(r_loc, B_tile), :] + jnp.dot(
                            h_p.astype(mxu_dtype), _w_rec,
                            preferred_element_type=jnp.float32)
                        # gate columns pre-permuted to [i | f | o | g]:
                        # one contiguous 3H-wide sigmoid + one tanh per step
                        sig = jax.nn.sigmoid(gates[:, :3 * H])
                        g_g = jnp.tanh(gates[:, 3 * H:])
                        i_g = sig[:, 0 * H:1 * H]
                        f_g = sig[:, 1 * H:2 * H]
                        o_g = sig[:, 2 * H:3 * H]
                        c_p = f_g * c_p + i_g * g_g
                        h_p = o_g * jnp.tanh(c_p)
                        r_glb = pl.multiple_of(_row0 + off, 8)
                        _dst[pl.ds(r_glb, B_tile), :] = h_p.astype(_dst.dtype)
                    return (h_p, c_p)

                h, c = lax.fori_loop(0, n_inner, chunk_body, (h, c))

            # ---- merged loc/scale head: accumulate this layer's tail -------
            tail = dst[pl.ds((T - Ts) * B_tile, Ts * B_tile), :]
            part = jnp.dot(tail.astype(mxu_dtype),
                           wh_ref[pl.ds(l * H, H), :],
                           preferred_element_type=jnp.float32)
            if l == 0:
                head_sc[...] = part
            else:
                head_sc[...] += part

        total = head_sc[...] + bh_ref[...]                # (Ts*B_tile, out_pad)
        col = lax.broadcasted_iota(jnp.int32, total.shape, 1)
        out = jnp.where(col < d_out, total, jax.nn.softplus(total) + eps)
        out_ref[...] = out.reshape(Ts, B_tile, out_pad)   # lane-dense store

    return kernel


# ----------------------------------------------------------------------------
# Parameter construction (deterministic, PyTorch-style uniform init)
# ----------------------------------------------------------------------------
def init_params(key, d_lag, d_cov, d_emb, d_output, d_hidden, N):
    params = {}
    keys = jax.random.split(key, 16)
    kit = iter(keys)

    params["emb"] = []
    for (num, dim) in d_emb:
        params["emb"].append(
            jax.random.normal(next(kit), (int(num), int(dim)), jnp.float32))

    d_emb_tot = int(sum(dim for (_, dim) in d_emb))
    d_in = d_lag + d_cov + d_emb_tot
    stdv = 1.0 / math.sqrt(d_hidden)

    # LSTM stack: transposed weights + fused bias, canonical (i,f,g,o) order
    params["lstm"] = []
    din = d_in
    for _ in range(N):
        w_ih = jax.random.uniform(next(kit), (4 * d_hidden, din),
                                  jnp.float32, -stdv, stdv)
        w_hh = jax.random.uniform(next(kit), (4 * d_hidden, d_hidden),
                                  jnp.float32, -stdv, stdv)
        b_ih = jax.random.uniform(next(kit), (4 * d_hidden,),
                                  jnp.float32, -stdv, stdv)
        b_hh = jax.random.uniform(next(kit), (4 * d_hidden,),
                                  jnp.float32, -stdv, stdv)
        params["lstm"].append(
            (w_ih.T, w_hh.T, (b_ih + b_hh).reshape(1, 4 * d_hidden)))
        din = d_hidden

    hn = d_hidden * N
    stdv_l = 1.0 / math.sqrt(hn)
    params["loc_w"] = jax.random.uniform(next(kit), (hn, d_output),
                                         jnp.float32, -stdv_l, stdv_l)
    params["loc_b"] = jax.random.uniform(next(kit), (1, d_output),
                                         jnp.float32, -stdv_l, stdv_l)
    params["scale_w"] = jax.random.uniform(next(kit), (hn, d_output),
                                           jnp.float32, -stdv_l, stdv_l)
    params["scale_b"] = jax.random.uniform(next(kit), (1, d_output),
                                           jnp.float32, -stdv_l, stdv_l)
    return params


# ----------------------------------------------------------------------------
# Forward pass (single fused Pallas call, batch-tiled grid)
# ----------------------------------------------------------------------------
def deepar_forward(params, x_lag, x_cov, x_idx, d_outputseqlen, *,
                   mxu_dtype=jnp.bfloat16):
    # Embedding lookup + concat (glue, plain JAX)
    x_emb = jnp.concatenate(
        [tbl[x_idx[:, :, i]] for i, tbl in enumerate(params["emb"])], axis=-1)
    T = x_lag.shape[0]
    inputs = jnp.concatenate([x_lag, x_cov[:T], x_emb[:T]], axis=-1)

    B, Din = inputs.shape[1], inputs.shape[2]
    H = params["lstm"][0][1].shape[0]
    N = len(params["lstm"])
    d_out = params["loc_w"].shape[1]
    Ts = int(d_outputseqlen)
    eps = 1e-6

    # Batch padded to sublane multiple; tiled over a parallel grid axis.
    B_pad = _round_up(max(B, 8), 8)
    B_tile = _pick_batch_tile(B_pad)      # >=128/256 at production batch sizes
    if B_pad != B:
        inputs = jnp.pad(inputs, ((0, 0), (0, B_pad - B), (0, 0)))
    grid = (B_pad // B_tile,)

    chunk = _pick_time_chunk(T)
    n_hbuf = min(N, 2)
    out_pad = _round_up(max(2 * d_out, 128), 128)

    # --- weight prep (hoist to init time in production) ----------------------
    # gate column order (i,f,g,o) -> (i,f,o,g): sigmoid covers one 3H block
    def permute_gates(w):
        i, f, g, o = jnp.split(w, 4, axis=-1)
        return jnp.concatenate([i, f, o, g], axis=-1)

    lstm_in, din_l = [], []
    for (w_ih_t, w_hh_t, bias) in params["lstm"]:
        din_l.append(w_ih_t.shape[0])
        lstm_in.append((permute_gates(w_ih_t).astype(mxu_dtype),
                        permute_gates(w_hh_t).astype(mxu_dtype),
                        permute_gates(bias)))                 # bias stays f32

    # merged + lane-padded (128-wide) loc/scale head
    w_heads = jnp.concatenate([params["loc_w"], params["scale_w"]], axis=1)
    b_heads = jnp.concatenate([params["loc_b"], params["scale_b"]], axis=1)
    w_heads = jnp.pad(w_heads, ((0, 0), (0, out_pad - 2 * d_out))).astype(mxu_dtype)
    b_heads = jnp.pad(b_heads, ((0, 0), (0, out_pad - 2 * d_out)))

    flat_in = [inputs]
    for (wi, wh, b) in lstm_in:
        flat_in += [wi, wh, b]
    flat_in += [w_heads, b_heads]

    # BlockSpecs: activations tiled over batch; weights full-block with
    # constant index maps so they stay resident across grid steps.
    const2 = lambda b: (0, 0)
    in_specs = [pl.BlockSpec((T, B_tile, Din), lambda b: (0, b, 0))]
    for l in range(N):
        in_specs += [pl.BlockSpec((din_l[l], 4 * H), const2),
                     pl.BlockSpec((H, 4 * H), const2),
                     pl.BlockSpec((1, 4 * H), const2)]
    in_specs += [pl.BlockSpec((H * N, out_pad), const2),
                 pl.BlockSpec((1, out_pad), const2)]
    out_spec = pl.BlockSpec((Ts, B_tile, out_pad), lambda b: (0, b, 0))

    # explicit scoped-VMEM budget (default is only 16/32 MiB)
    scratch_bytes = (chunk * B_tile * 4 * H * 4
                     + n_hbuf * T * B_tile * H * 4
                     + Ts * B_tile * out_pad * 4)
    w_bytes = sum(int(a.size) * a.dtype.itemsize for a in flat_in[1:])
    need = (2 * T * B_tile * Din * 4 + 2 * Ts * B_tile * out_pad * 4
            + 2 * w_bytes + scratch_bytes)
    vmem_limit = int(min(max(2 * need, 32 * 2 ** 20), 64 * 2 ** 20))

    kernel = _make_fused_kernel(T, B_tile, Din, H, N, d_out, out_pad, Ts,
                                chunk, eps, mxu_dtype)
    out = pl.pallas_call(
        kernel,
        grid=grid,
        out_shape=jax.ShapeDtypeStruct((Ts, B_pad, out_pad), jnp.float32),
        in_specs=in_specs,
        out_specs=out_spec,
        scratch_shapes=(
            [pltpu.VMEM((chunk * B_tile, 4 * H), jnp.float32)]        # xproj
            + [pltpu.VMEM((T * B_tile, H), jnp.float32)               # rotating
               for _ in range(n_hbuf)]                                 # hidden
            + [pltpu.VMEM((Ts * B_tile, out_pad), jnp.float32)]),     # head acc
        compiler_params=pltpu.CompilerParams(
            dimension_semantics=("parallel",),
            vmem_limit_bytes=vmem_limit),
    )(*flat_in)

    loc = out[:, :B, :d_out]
    scale = out[:, :B, d_out:2 * d_out]
    return loc, scale


# ----------------------------------------------------------------------------
# Pure-JAX reference (for correctness check)
# ----------------------------------------------------------------------------
def _lstm_ref(x, w_ih_t, w_hh_t, bias):
    H = w_hh_t.shape[0]
    B = x.shape[1]

    def step(carry, x_t):
        h, c = carry
        gates = (jnp.dot(x_t, w_ih_t, precision=lax.Precision.HIGHEST)
                 + jnp.dot(h, w_hh_t, precision=lax.Precision.HIGHEST)
                 + bias[0])
        i_g = jax.nn.sigmoid(gates[:, 0 * H:1 * H])
        f_g = jax.nn.sigmoid(gates[:, 1 * H:2 * H])
        g_g = jnp.tanh(gates[:, 2 * H:3 * H])
        o_g = jax.nn.sigmoid(gates[:, 3 * H:4 * H])
        c = f_g * c + i_g * g_g
        h = o_g * jnp.tanh(c)
        return (h, c), h

    init = (jnp.zeros((B, H), jnp.float32), jnp.zeros((B, H), jnp.float32))
    _, ys = lax.scan(step, init, x)
    return ys


def deepar_ref(params, x_lag, x_cov, x_idx, d_outputseqlen):
    x_emb = jnp.concatenate(
        [tbl[x_idx[:, :, i]] for i, tbl in enumerate(params["emb"])], axis=-1)
    T = x_lag.shape[0]
    inputs = jnp.concatenate([x_lag, x_cov[:T], x_emb[:T]], axis=-1)
    hs = []
    for (w_ih_t, w_hh_t, bias) in params["lstm"]:
        out = _lstm_ref(inputs, w_ih_t, w_hh_t, bias)
        inputs = out
        hs.append(out)
    h = jnp.concatenate(hs, axis=-1)
    h_tail = h[-d_outputseqlen:]
    loc = jnp.einsum("tbh,ho->tbo", h_tail, params["loc_w"],
                     precision=lax.Precision.HIGHEST) + params["loc_b"][0]
    sc = jnp.einsum("tbh,ho->tbo", h_tail, params["scale_w"],
                    precision=lax.Precision.HIGHEST) + params["scale_b"][0]
    return loc, jax.nn.softplus(sc) + 1e-6


# ----------------------------------------------------------------------------
if __name__ == "__main__":
    # Model hyper-parameters (small, consistent with deepar.__init__)
    d_lag, d_cov = 1, 2
    d_emb = [(5, 3), (7, 4)]          # (cardinality, emb_dim) per categorical
    d_output, d_hidden, N = 2, 32, 2
    T, T_cov, B = 8, 10, 2            # x_lag seq len, x_cov/x_idx seq len, batch
    d_outputseqlen = 4

    key = jax.random.PRNGKey(0)
    k_p, k_lag, k_cov, k_i1, k_i2 = jax.random.split(key, 5)

    params = init_params(k_p, d_lag, d_cov, d_emb, d_output, d_hidden, N)

    x_lag = jax.random.normal(k_lag, (T, B, d_lag), jnp.float32)
    x_cov = jax.random.normal(k_cov, (T_cov, B, d_cov), jnp.float32)
    x_idx = jnp.stack(
        [jax.random.randint(k_i1, (T_cov, B), 0, d_emb[0][0]),
         jax.random.randint(k_i2, (T_cov, B), 0, d_emb[1][0])], axis=-1)

    loc_ref, scale_ref = deepar_ref(params, x_lag, x_cov, x_idx, d_outputseqlen)

    # f32 MXU operands: tight check of the fused-kernel semantics
    loc32, scale32 = deepar_forward(params, x_lag, x_cov, x_idx,
                                    d_outputseqlen, mxu_dtype=jnp.float32)
    jax.block_until_ready((loc32, scale32))
    assert loc32.shape == (d_outputseqlen, B, d_output)
    assert scale32.shape == (d_outputseqlen, B, d_output)
    assert jnp.allclose(loc32, loc_ref, atol=3e-3, rtol=3e-3)
    assert jnp.allclose(scale32, scale_ref, atol=3e-3, rtol=3e-3)
    assert bool(jnp.all(scale32 > 0))

    # bf16 MXU operands (recommended for v6e/v7x throughput): looser tolerance
    loc16, scale16 = deepar_forward(params, x_lag, x_cov, x_idx,
                                    d_outputseqlen, mxu_dtype=jnp.bfloat16)
    jax.block_until_ready((loc16, scale16))
    assert loc16.shape == (d_outputseqlen, B, d_output)
    assert jnp.allclose(loc16, loc_ref, atol=5e-2, rtol=5e-2)
    assert jnp.allclose(scale16, scale_ref, atol=5e-2, rtol=5e-2)
    assert bool(jnp.all(scale16 > 0))

    print("KERNEL_OK")
</pallas_src>

<mosaic_0001>
module attributes {stable_mosaic.version = 11 : i64} {
  func.func @kernel(%arg0: i32, %arg1: memref<8x8x10xf32, #tpu.memory_space<vmem>>, %arg2: memref<10x128xf32, #tpu.memory_space<vmem>>, %arg3: memref<32x128xf32, #tpu.memory_space<vmem>>, %arg4: memref<1x128xf32, #tpu.memory_space<vmem>>, %arg5: memref<32x128xf32, #tpu.memory_space<vmem>>, %arg6: memref<32x128xf32, #tpu.memory_space<vmem>>, %arg7: memref<1x128xf32, #tpu.memory_space<vmem>>, %arg8: memref<64x128xf32, #tpu.memory_space<vmem>>, %arg9: memref<1x128xf32, #tpu.memory_space<vmem>>, %arg10: memref<4x8x128xf32, #tpu.memory_space<vmem>>, %arg11: memref<64x128xf32, #tpu.memory_space<vmem>>, %arg12: memref<64x32xf32, #tpu.memory_space<vmem>>, %arg13: memref<64x32xf32, #tpu.memory_space<vmem>>, %arg14: memref<32x128xf32, #tpu.memory_space<vmem>>) attributes {dimension_semantics = [#tpu.dimension_semantics<parallel>], iteration_bounds = array<i64: 1>, scalar_prefetch = 0 : i64, scratch_operands = 4 : i64, tpu.core_type = #tpu.core_type<tc>, window_params = [{transform_indices = @transform_0, window_bounds = array<i64: 8, 8, 10>}, {pipeline_mode = #tpu.pipeline_mode<synchronous>, transform_indices = @transform_1, window_bounds = array<i64: 10, 128>}, {pipeline_mode = #tpu.pipeline_mode<synchronous>, transform_indices = @transform_2, window_bounds = array<i64: 32, 128>}, {pipeline_mode = #tpu.pipeline_mode<synchronous>, transform_indices = @transform_3, window_bounds = array<i64: 1, 128>}, {pipeline_mode = #tpu.pipeline_mode<synchronous>, transform_indices = @transform_4, window_bounds = array<i64: 32, 128>}, {pipeline_mode = #tpu.pipeline_mode<synchronous>, transform_indices = @transform_5, window_bounds = array<i64: 32, 128>}, {pipeline_mode = #tpu.pipeline_mode<synchronous>, transform_indices = @transform_6, window_bounds = array<i64: 1, 128>}, {pipeline_mode = #tpu.pipeline_mode<synchronous>, transform_indices = @transform_7, window_bounds = array<i64: 64, 128>}, {pipeline_mode = #tpu.pipeline_mode<synchronous>, transform_indices = @transform_8, window_bounds = array<i64: 1, 128>}, {transform_indices = @transform_9, window_bounds = array<i64: 4, 8, 128>}]} {
    %c0 = arith.constant 0 : index
    %c0_0 = arith.constant 0 : index
    %0 = vector.load %arg2[%c0, %c0_0] : memref<10x128xf32, #tpu.memory_space<vmem>>, vector<10x128xf32>
    %c0_1 = arith.constant 0 : index
    %c0_2 = arith.constant 0 : index
    %1 = vector.load %arg3[%c0_1, %c0_2] : memref<32x128xf32, #tpu.memory_space<vmem>>, vector<32x128xf32>
    %c0_3 = arith.constant 0 : index
    %c0_4 = arith.constant 0 : index
    %2 = vector.load %arg4[%c0_3, %c0_4] : memref<1x128xf32, #tpu.memory_space<vmem>>, vector<1x128xf32>
    %cst = arith.constant 0.000000e+00 : f32
    %3 = vector.broadcast %cst : f32 to vector<8x32xf32>
    %cst_5 = arith.constant 0.000000e+00 : f32
    %4 = vector.broadcast %cst_5 : f32 to vector<8x32xf32>
    %c0_6 = arith.constant 0 : index
    %c0_7 = arith.constant 0 : index
    %c0_8 = arith.constant 0 : index
    %5 = vector.load %arg1[%c0_6, %c0_7, %c0_8] : memref<8x8x10xf32, #tpu.memory_space<vmem>>, vector<8x8x10xf32>
    %6 = vector.shape_cast %5 : vector<8x8x10xf32> to vector<64x10xf32>
    %cst_9 = arith.constant dense<0.000000e+00> : vector<64x128xf32>
    %7 = tpu.matmul %6, %0, %cst_9 {dimension_numbers = #tpu.dot_dimension_numbers<[1], [0], [0], [1], [0, 0, 1, 1], [], []>} : vector<64x10xf32>, vector<10x128xf32>, vector<64x128xf32> -> vector<64x128xf32>
    %8 = vector.broadcast %2 : vector<1x128xf32> to vector<64x128xf32>
    %9 = arith.addf %7, %8 : vector<64x128xf32>
    %c0_10 = arith.constant 0 : index
    %c0_11 = arith.constant 0 : index
    %10 = vector.load %arg11[%c0_10, %c0_11] : memref<64x128xf32, #tpu.memory_space<vmem>>, vector<64x128xf32>
    tpu.vector_store %arg11[%c0_10, %c0_11], %9 {strides = array<i32>} : memref<64x128xf32, #tpu.memory_space<vmem>>, vector<64x128xf32>,
    %c0_i32 = arith.constant 0 : i32
    %c64_i32 = arith.constant 64 : i32
    %11 = arith.muli %c0_i32, %c64_i32 : i32
    %c0_i32_12 = arith.constant 0 : i32
    %12 = arith.addi %11, %c0_i32_12 : i32
    %13 = tpu.assume_multiple %12, 8 : i32
    %14 = arith.index_cast %13 : i32 to index
    %c0_13 = arith.constant 0 : index
    %15 = vector.load %arg11[%14, %c0_13] : memref<64x128xf32, #tpu.memory_space<vmem>>, vector<8x128xf32>
    %cst_14 = arith.constant dense<0.000000e+00> : vector<8x128xf32>
    %16 = tpu.matmul %3, %1, %cst_14 {dimension_numbers = #tpu.dot_dimension_numbers<[1], [0], [0], [1], [0, 0, 1, 1], [], []>} : vector<8x32xf32>, vector<32x128xf32>, vector<8x128xf32> -> vector<8x128xf32>
    %17 = arith.addf %15, %16 : vector<8x128xf32>
    %18 = vector.extract_strided_slice %17 {offsets = [0, 0], sizes = [8, 96], strides = [1, 1]} : vector<8x128xf32> to vector<8x96xf32>
    %19 = arith.negf %18 : vector<8x96xf32>
    %20 = math.exp %19 : vector<8x96xf32>
    %cst_15 = arith.constant 1.000000e+00 : f32
    %21 = vector.broadcast %cst_15 : f32 to vector<8x96xf32>
    %22 = arith.addf %21, %20 : vector<8x96xf32>
    %23 = arith.divf %21, %22 : vector<8x96xf32>
    %24 = vector.extract_strided_slice %17 {offsets = [0, 96], sizes = [8, 32], strides = [1, 1]} : vector<8x128xf32> to vector<8x32xf32>
    %25 = math.tanh %24 : vector<8x32xf32>
    %26 = vector.extract_strided_slice %23 {offsets = [0, 0], sizes = [8, 32], strides = [1, 1]} : vector<8x96xf32> to vector<8x32xf32>
    %27 = vector.extract_strided_slice %23 {offsets = [0, 32], sizes = [8, 32], strides = [1, 1]} : vector<8x96xf32> to vector<8x32xf32>
    %28 = vector.extract_strided_slice %23 {offsets = [0, 64], sizes = [8, 32], strides = [1, 1]} : vector<8x96xf32> to vector<8x32xf32>
    %29 = arith.mulf %27, %4 : vector<8x32xf32>
    %30 = arith.mulf %26, %25 : vector<8x32xf32>
    %31 = arith.addf %29, %30 : vector<8x32xf32>
    %32 = math.tanh %31 : vector<8x32xf32>
    %33 = arith.mulf %28, %32 : vector<8x32xf32>
    %c0_i32_16 = arith.constant 0 : i32
    %34 = arith.addi %c0_i32_16, %12 : i32
    %35 = tpu.assume_multiple %34, 8 : i32
    %36 = arith.index_cast %35 : i32 to index
    %c0_17 = arith.constant 0 : index
    %37 = vector.load %arg12[%36, %c0_17] : memref<64x32xf32, #tpu.memory_space<vmem>>, vector<8x32xf32>
    tpu.vector_store %arg12[%36, %c0_17], %33 {strides = array<i32>} : memref<64x32xf32, #tpu.memory_space<vmem>>, vector<8x32xf32>,
    %c64_i32_18 = arith.constant 64 : i32
    %38 = arith.muli %c0_i32, %c64_i32_18 : i32
    %c8_i32 = arith.constant 8 : i32
    %39 = arith.addi %38, %c8_i32 : i32
    %40 = tpu.assume_multiple %39, 8 : i32
    %41 = arith.index_cast %40 : i32 to index
    %c0_19 = arith.constant 0 : index
    %42 = vector.load %arg11[%41, %c0_19] : memref<64x128xf32, #tpu.memory_space<vmem>>, vector<8x128xf32>
    %cst_20 = arith.constant dense<0.000000e+00> : vector<8x128xf32>
    %43 = tpu.matmul %33, %1, %cst_20 {dimension_numbers = #tpu.dot_dimension_numbers<[1], [0], [0], [1], [0, 0, 1, 1], [], []>} : vector<8x32xf32>, vector<32x128xf32>, vector<8x128xf32> -> vector<8x128xf32>
    %44 = arith.addf %42, %43 : vector<8x128xf32>
    %45 = vector.extract_strided_slice %44 {offsets = [0, 0], sizes = [8, 96], strides = [1, 1]} : vector<8x128xf32> to vector<8x96xf32>
    %46 = arith.negf %45 : vector<8x96xf32>
    %47 = math.exp %46 : vector<8x96xf32>
    %cst_21 = arith.constant 1.000000e+00 : f32
    %48 = vector.broadcast %cst_21 : f32 to vector<8x96xf32>
    %49 = arith.addf %48, %47 : vector<8x96xf32>
    %50 = arith.divf %48, %49 : vector<8x96xf32>
    %51 = vector.extract_strided_slice %44 {offsets = [0, 96], sizes = [8, 32], strides = [1, 1]} : vector<8x128xf32> to vector<8x32xf32>
    %52 = math.tanh %51 : vector<8x32xf32>
    %53 = vector.extract_strided_slice %50 {offsets = [0, 0], sizes = [8, 32], strides = [1, 1]} : vector<8x96xf32> to vector<8x32xf32>
    %54 = vector.extract_strided_slice %50 {offsets = [0, 32], sizes = [8, 32], strides = [1, 1]} : vector<8x96xf32> to vector<8x32xf32>
    %55 = vector.extract_strided_slice %50 {offsets = [0, 64], sizes = [8, 32], strides = [1, 1]} : vector<8x96xf32> to vector<8x32xf32>
    %56 = arith.mulf %54, %31 : vector<8x32xf32>
    %57 = arith.mulf %53, %52 : vector<8x32xf32>
    %58 = arith.addf %56, %57 : vector<8x32xf32>
    %59 = math.tanh %58 : vector<8x32xf32>
    %60 = arith.mulf %55, %59 : vector<8x32xf32>
    %c0_i32_22 = arith.constant 0 : i32
    %61 = arith.addi %c0_i32_22, %39 : i32
    %62 = tpu.assume_multiple %61, 8 : i32
    %63 = arith.index_cast %62 : i32 to index
    %c0_23 = arith.constant 0 : index
    %64 = vector.load %arg12[%63, %c0_23] : memref<64x32xf32, #tpu.memory_space<vmem>>, vector<8x32xf32>
    tpu.vector_store %arg12[%63, %c0_23], %60 {strides = array<i32>} : memref<64x32xf32, #tpu.memory_space<vmem>>, vector<8x32xf32>,
    %c64_i32_24 = arith.constant 64 : i32
    %65 = arith.muli %c0_i32, %c64_i32_24 : i32
    %c16_i32 = arith.constant 16 : i32
    %66 = arith.addi %65, %c16_i32 : i32
    %67 = tpu.assume_multiple %66, 8 : i32
    %68 = arith.index_cast %67 : i32 to index
    %c0_25 = arith.constant 0 : index
    %69 = vector.load %arg11[%68, %c0_25] : memref<64x128xf32, #tpu.memory_space<vmem>>, vector<8x128xf32>
    %cst_26 = arith.constant dense<0.000000e+00> : vector<8x128xf32>
    %70 = tpu.matmul %60, %1, %cst_26 {dimension_numbers = #tpu.dot_dimension_numbers<[1], [0], [0], [1], [0, 0, 1, 1], [], []>} : vector<8x32xf32>, vector<32x128xf32>, vector<8x128xf32> -> vector<8x128xf32>
    %71 = arith.addf %69, %70 : vector<8x128xf32>
    %72 = vector.extract_strided_slice %71 {offsets = [0, 0], sizes = [8, 96], strides = [1, 1]} : vector<8x128xf32> to vector<8x96xf32>
    %73 = arith.negf %72 : vector<8x96xf32>
    %74 = math.exp %73 : vector<8x96xf32>
    %cst_27 = arith.constant 1.000000e+00 : f32
    %75 = vector.broadcast %cst_27 : f32 to vector<8x96xf32>
    %76 = arith.addf %75, %74 : vector<8x96xf32>
    %77 = arith.divf %75, %76 : vector<8x96xf32>
    %78 = vector.extract_strided_slice %71 {offsets = [0, 96], sizes = [8, 32], strides = [1, 1]} : vector<8x128xf32> to vector<8x32xf32>
    %79 = math.tanh %78 : vector<8x32xf32>
    %80 = vector.extract_strided_slice %77 {offsets = [0, 0], sizes = [8, 32], strides = [1, 1]} : vector<8x96xf32> to vector<8x32xf32>
    %81 = vector.extract_strided_slice %77 {offsets = [0, 32], sizes = [8, 32], strides = [1, 1]} : vector<8x96xf32> to vector<8x32xf32>
    %82 = vector.extract_strided_slice %77 {offsets = [0, 64], sizes = [8, 32], strides = [1, 1]} : vector<8x96xf32> to vector<8x32xf32>
    %83 = arith.mulf %81, %58 : vector<8x32xf32>
    %84 = arith.mulf %80, %79 : vector<8x32xf32>
    %85 = arith.addf %83, %84 : vector<8x32xf32>
    %86 = math.tanh %85 : vector<8x32xf32>
    %87 = arith.mulf %82, %86 : vector<8x32xf32>
    %c0_i32_28 = arith.constant 0 : i32
    %88 = arith.addi %c0_i32_28, %66 : i32
    %89 = tpu.assume_multiple %88, 8 : i32
    %90 = arith.index_cast %89 : i32 to index
    %c0_29 = arith.constant 0 : index
    %91 = vector.load %arg12[%90, %c0_29] : memref<64x32xf32, #tpu.memory_space<vmem>>, vector<8x32xf32>
    tpu.vector_store %arg12[%90, %c0_29], %87 {strides = array<i32>} : memref<64x32xf32, #tpu.memory_space<vmem>>, vector<8x32xf32>,
    %c64_i32_30 = arith.constant 64 : i32
    %92 = arith.muli %c0_i32, %c64_i32_30 : i32
    %c24_i32 = arith.constant 24 : i32
    %93 = arith.addi %92, %c24_i32 : i32
    %94 = tpu.assume_multiple %93, 8 : i32
    %95 = arith.index_cast %94 : i32 to index
    %c0_31 = arith.constant 0 : index
    %96 = vector.load %arg11[%95, %c0_31] : memref<64x128xf32, #tpu.memory_space<vmem>>, vector<8x128xf32>
    %cst_32 = arith.constant dense<0.000000e+00> : vector<8x128xf32>
    %97 = tpu.matmul %87, %1, %cst_32 {dimension_numbers = #tpu.dot_dimension_numbers<[1], [0], [0], [1], [0, 0, 1, 1], [], []>} : vector<8x32xf32>, vector<32x128xf32>, vector<8x128xf32> -> vector<8x128xf32>
    %98 = arith.addf %96, %97 : vector<8x128xf32>
    %99 = vector.extract_strided_slice %98 {offsets = [0, 0], sizes = [8, 96], strides = [1, 1]} : vector<8x128xf32> to vector<8x96xf32>
    %100 = arith.negf %99 : vector<8x96xf32>
    %101 = math.exp %100 : vector<8x96xf32>
    %cst_33 = arith.constant 1.000000e+00 : f32
    %102 = vector.broadcast %cst_33 : f32 to vector<8x96xf32>
    %103 = arith.addf %102, %101 : vector<8x96xf32>
    %104 = arith.divf %102, %103 : vector<8x96xf32>
    %105 = vector.extract_strided_slice %98 {offsets = [0, 96], sizes = [8, 32], strides = [1, 1]} : vector<8x128xf32> to vector<8x32xf32>
    %106 = math.tanh %105 : vector<8x32xf32>
    %107 = vector.extract_strided_slice %104 {offsets = [0, 0], sizes = [8, 32], strides = [1, 1]} : vector<8x96xf32> to vector<8x32xf32>
    %108 = vector.extract_strided_slice %104 {offsets = [0, 32], sizes = [8, 32], strides = [1, 1]} : vector<8x96xf32> to vector<8x32xf32>
    %109 = vector.extract_strided_slice %104 {offsets = [0, 64], sizes = [8, 32], strides = [1, 1]} : vector<8x96xf32> to vector<8x32xf32>
    %110 = arith.mulf %108, %85 : vector<8x32xf32>
    %111 = arith.mulf %107, %106 : vector<8x32xf32>
    %112 = arith.addf %110, %111 : vector<8x32xf32>
    %113 = math.tanh %112 : vector<8x32xf32>
    %114 = arith.mulf %109, %113 : vector<8x32xf32>
    %c0_i32_34 = arith.constant 0 : i32
    %115 = arith.addi %c0_i32_34, %93 : i32
    %116 = tpu.assume_multiple %115, 8 : i32
    %117 = arith.index_cast %116 : i32 to index
    %c0_35 = arith.constant 0 : index
    %118 = vector.load %arg12[%117, %c0_35] : memref<64x32xf32, #tpu.memory_space<vmem>>, vector<8x32xf32>
    tpu.vector_store %arg12[%117, %c0_35], %114 {strides = array<i32>} : memref<64x32xf32, #tpu.memory_space<vmem>>, vector<8x32xf32>,
    %c64_i32_36 = arith.constant 64 : i32
    %119 = arith.muli %c0_i32, %c64_i32_36 : i32
    %c32_i32 = arith.constant 32 : i32
    %120 = arith.addi %119, %c32_i32 : i32
    %121 = tpu.assume_multiple %120, 8 : i32
    %122 = arith.index_cast %121 : i32 to index
    %c0_37 = arith.constant 0 : index
    %123 = vector.load %arg11[%122, %c0_37] : memref<64x128xf32, #tpu.memory_space<vmem>>, vector<8x128xf32>
    %cst_38 = arith.constant dense<0.000000e+00> : vector<8x128xf32>
    %124 = tpu.matmul %114, %1, %cst_38 {dimension_numbers = #tpu.dot_dimension_numbers<[1], [0], [0], [1], [0, 0, 1, 1], [], []>} : vector<8x32xf32>, vector<32x128xf32>, vector<8x128xf32> -> vector<8x128xf32>
    %125 = arith.addf %123, %124 : vector<8x128xf32>
    %126 = vector.extract_strided_slice %125 {offsets = [0, 0], sizes = [8, 96], strides = [1, 1]} : vector<8x128xf32> to vector<8x96xf32>
    %127 = arith.negf %126 : vector<8x96xf32>
    %128 = math.exp %127 : vector<8x96xf32>
    %cst_39 = arith.constant 1.000000e+00 : f32
    %129 = vector.broadcast %cst_39 : f32 to vector<8x96xf32>
    %130 = arith.addf %129, %128 : vector<8x96xf32>
    %131 = arith.divf %129, %130 : vector<8x96xf32>
    %132 = vector.extract_strided_slice %125 {offsets = [0, 96], sizes = [8, 32], strides = [1, 1]} : vector<8x128xf32> to vector<8x32xf32>
    %133 = math.tanh %132 : vector<8x32xf32>
    %134 = vector.extract_strided_slice %131 {offsets = [0, 0], sizes = [8, 32], strides = [1, 1]} : vector<8x96xf32> to vector<8x32xf32>
    %135 = vector.extract_strided_slice %131 {offsets = [0, 32], sizes = [8, 32], strides = [1, 1]} : vector<8x96xf32> to vector<8x32xf32>
    %136 = vector.extract_strided_slice %131 {offsets = [0, 64], sizes = [8, 32], strides = [1, 1]} : vector<8x96xf32> to vector<8x32xf32>
    %137 = arith.mulf %135, %112 : vector<8x32xf32>
    %138 = arith.mulf %134, %133 : vector<8x32xf32>
    %139 = arith.addf %137, %138 : vector<8x32xf32>
    %140 = math.tanh %139 : vector<8x32xf32>
    %141 = arith.mulf %136, %140 : vector<8x32xf32>
    %c0_i32_40 = arith.constant 0 : i32
    %142 = arith.addi %c0_i32_40, %120 : i32
    %143 = tpu.assume_multiple %142, 8 : i32
    %144 = arith.index_cast %143 : i32 to index
    %c0_41 = arith.constant 0 : index
    %145 = vector.load %arg12[%144, %c0_41] : memref<64x32xf32, #tpu.memory_space<vmem>>, vector<8x32xf32>
    tpu.vector_store %arg12[%144, %c0_41], %141 {strides = array<i32>} : memref<64x32xf32, #tpu.memory_space<vmem>>, vector<8x32xf32>,
    %c64_i32_42 = arith.constant 64 : i32
    %146 = arith.muli %c0_i32, %c64_i32_42 : i32
    %c40_i32 = arith.constant 40 : i32
    %147 = arith.addi %146, %c40_i32 : i32
    %148 = tpu.assume_multiple %147, 8 : i32
    %149 = arith.index_cast %148 : i32 to index
    %c0_43 = arith.constant 0 : index
    %150 = vector.load %arg11[%149, %c0_43] : memref<64x128xf32, #tpu.memory_space<vmem>>, vector<8x128xf32>
    %cst_44 = arith.constant dense<0.000000e+00> : vector<8x128xf32>
    %151 = tpu.matmul %141, %1, %cst_44 {dimension_numbers = #tpu.dot_dimension_numbers<[1], [0], [0], [1], [0, 0, 1, 1], [], []>} : vector<8x32xf32>, vector<32x128xf32>, vector<8x128xf32> -> vector<8x128xf32>
    %152 = arith.addf %150, %151 : vector<8x128xf32>
    %153 = vector.extract_strided_slice %152 {offsets = [0, 0], sizes = [8, 96], strides = [1, 1]} : vector<8x128xf32> to vector<8x96xf32>
    %154 = arith.negf %153 : vector<8x96xf32>
    %155 = math.exp %154 : vector<8x96xf32>
    %cst_45 = arith.constant 1.000000e+00 : f32
    %156 = vector.broadcast %cst_45 : f32 to vector<8x96xf32>
    %157 = arith.addf %156, %155 : vector<8x96xf32>
    %158 = arith.divf %156, %157 : vector<8x96xf32>
    %159 = vector.extract_strided_slice %152 {offsets = [0, 96], sizes = [8, 32], strides = [1, 1]} : vector<8x128xf32> to vector<8x32xf32>
    %160 = math.tanh %159 : vector<8x32xf32>
    %161 = vector.extract_strided_slice %158 {offsets = [0, 0], sizes = [8, 32], strides = [1, 1]} : vector<8x96xf32> to vector<8x32xf32>
    %162 = vector.extract_strided_slice %158 {offsets = [0, 32], sizes = [8, 32], strides = [1, 1]} : vector<8x96xf32> to vector<8x32xf32>
    %163 = vector.extract_strided_slice %158 {offsets = [0, 64], sizes = [8, 32], strides = [1, 1]} : vector<8x96xf32> to vector<8x32xf32>
    %164 = arith.mulf %162, %139 : vector<8x32xf32>
    %165 = arith.mulf %161, %160 : vector<8x32xf32>
    %166 = arith.addf %164, %165 : vector<8x32xf32>
    %167 = math.tanh %166 : vector<8x32xf32>
    %168 = arith.mulf %163, %167 : vector<8x32xf32>
    %c0_i32_46 = arith.constant 0 : i32
    %169 = arith.addi %c0_i32_46, %147 : i32
    %170 = tpu.assume_multiple %169, 8 : i32
    %171 = arith.index_cast %170 : i32 to index
    %c0_47 = arith.constant 0 : index
    %172 = vector.load %arg12[%171, %c0_47] : memref<64x32xf32, #tpu.memory_space<vmem>>, vector<8x32xf32>
    tpu.vector_store %arg12[%171, %c0_47], %168 {strides = array<i32>} : memref<64x32xf32, #tpu.memory_space<vmem>>, vector<8x32xf32>,
    %c64_i32_48 = arith.constant 64 : i32
    %173 = arith.muli %c0_i32, %c64_i32_48 : i32
    %c48_i32 = arith.constant 48 : i32
    %174 = arith.addi %173, %c48_i32 : i32
    %175 = tpu.assume_multiple %174, 8 : i32
    %176 = arith.index_cast %175 : i32 to index
    %c0_49 = arith.constant 0 : index
    %177 = vector.load %arg11[%176, %c0_49] : memref<64x128xf32, #tpu.memory_space<vmem>>, vector<8x128xf32>
    %cst_50 = arith.constant dense<0.000000e+00> : vector<8x128xf32>
    %178 = tpu.matmul %168, %1, %cst_50 {dimension_numbers = #tpu.dot_dimension_numbers<[1], [0], [0], [1], [0, 0, 1, 1], [], []>} : vector<8x32xf32>, vector<32x128xf32>, vector<8x128xf32> -> vector<8x128xf32>
    %179 = arith.addf %177, %178 : vector<8x128xf32>
    %180 = vector.extract_strided_slice %179 {offsets = [0, 0], sizes = [8, 96], strides = [1, 1]} : vector<8x128xf32> to vector<8x96xf32>
    %181 = arith.negf %180 : vector<8x96xf32>
    %182 = math.exp %181 : vector<8x96xf32>
    %cst_51 = arith.constant 1.000000e+00 : f32
    %183 = vector.broadcast %cst_51 : f32 to vector<8x96xf32>
    %184 = arith.addf %183, %182 : vector<8x96xf32>
    %185 = arith.divf %183, %184 : vector<8x96xf32>
    %186 = vector.extract_strided_slice %179 {offsets = [0, 96], sizes = [8, 32], strides = [1, 1]} : vector<8x128xf32> to vector<8x32xf32>
    %187 = math.tanh %186 : vector<8x32xf32>
    %188 = vector.extract_strided_slice %185 {offsets = [0, 0], sizes = [8, 32], strides = [1, 1]} : vector<8x96xf32> to vector<8x32xf32>
    %189 = vector.extract_strided_slice %185 {offsets = [0, 32], sizes = [8, 32], strides = [1, 1]} : vector<8x96xf32> to vector<8x32xf32>
    %190 = vector.extract_strided_slice %185 {offsets = [0, 64], sizes = [8, 32], strides = [1, 1]} : vector<8x96xf32> to vector<8x32xf32>
    %191 = arith.mulf %189, %166 : vector<8x32xf32>
    %192 = arith.mulf %188, %187 : vector<8x32xf32>
    %193 = arith.addf %191, %192 : vector<8x32xf32>
    %194 = math.tanh %193 : vector<8x32xf32>
    %195 = arith.mulf %190, %194 : vector<8x32xf32>
    %c0_i32_52 = arith.constant 0 : i32
    %196 = arith.addi %c0_i32_52, %174 : i32
    %197 = tpu.assume_multiple %196, 8 : i32
    %198 = arith.index_cast %197 : i32 to index
    %c0_53 = arith.constant 0 : index
    %199 = vector.load %arg12[%198, %c0_53] : memref<64x32xf32, #tpu.memory_space<vmem>>, vector<8x32xf32>
    tpu.vector_store %arg12[%198, %c0_53], %195 {strides = array<i32>} : memref<64x32xf32, #tpu.memory_space<vmem>>, vector<8x32xf32>,
    %c64_i32_54 = arith.constant 64 : i32
    %200 = arith.muli %c0_i32, %c64_i32_54 : i32
    %c56_i32 = arith.constant 56 : i32
    %201 = arith.addi %200, %c56_i32 : i32
    %202 = tpu.assume_multiple %201, 8 : i32
    %203 = arith.index_cast %202 : i32 to index
    %c0_55 = arith.constant 0 : index
    %204 = vector.load %arg11[%203, %c0_55] : memref<64x128xf32, #tpu.memory_space<vmem>>, vector<8x128xf32>
    %cst_56 = arith.constant dense<0.000000e+00> : vector<8x128xf32>
    %205 = tpu.matmul %195, %1, %cst_56 {dimension_numbers = #tpu.dot_dimension_numbers<[1], [0], [0], [1], [0, 0, 1, 1], [], []>} : vector<8x32xf32>, vector<32x128xf32>, vector<8x128xf32> -> vector<8x128xf32>
    %206 = arith.addf %204, %205 : vector<8x128xf32>
    %207 = vector.extract_strided_slice %206 {offsets = [0, 0], sizes = [8, 96], strides = [1, 1]} : vector<8x128xf32> to vector<8x96xf32>
    %208 = arith.negf %207 : vector<8x96xf32>
    %209 = math.exp %208 : vector<8x96xf32>
    %cst_57 = arith.constant 1.000000e+00 : f32
    %210 = vector.broadcast %cst_57 : f32 to vector<8x96xf32>
    %211 = arith.addf %210, %209 : vector<8x96xf32>
    %212 = arith.divf %210, %211 : vector<8x96xf32>
    %213 = vector.extract_strided_slice %206 {offsets = [0, 96], sizes = [8, 32], strides = [1, 1]} : vector<8x128xf32> to vector<8x32xf32>
    %214 = math.tanh %213 : vector<8x32xf32>
    %215 = vector.extract_strided_slice %212 {offsets = [0, 0], sizes = [8, 32], strides = [1, 1]} : vector<8x96xf32> to vector<8x32xf32>
    %216 = vector.extract_strided_slice %212 {offsets = [0, 32], sizes = [8, 32], strides = [1, 1]} : vector<8x96xf32> to vector<8x32xf32>
    %217 = vector.extract_strided_slice %212 {offsets = [0, 64], sizes = [8, 32], strides = [1, 1]} : vector<8x96xf32> to vector<8x32xf32>
    %218 = arith.mulf %216, %193 : vector<8x32xf32>
    %219 = arith.mulf %215, %214 : vector<8x32xf32>
    %220 = arith.addf %218, %219 : vector<8x32xf32>
    %221 = math.tanh %220 : vector<8x32xf32>
    %222 = arith.mulf %217, %221 : vector<8x32xf32>
    %c0_i32_58 = arith.constant 0 : i32
    %223 = arith.addi %c0_i32_58, %201 : i32
    %224 = tpu.assume_multiple %223, 8 : i32
    %225 = arith.index_cast %224 : i32 to index
    %c0_59 = arith.constant 0 : index
    %226 = vector.load %arg12[%225, %c0_59] : memref<64x32xf32, #tpu.memory_space<vmem>>, vector<8x32xf32>
    tpu.vector_store %arg12[%225, %c0_59], %222 {strides = array<i32>} : memref<64x32xf32, #tpu.memory_space<vmem>>, vector<8x32xf32>,
    %c1_i32 = arith.constant 1 : i32
    %c32 = arith.constant 32 : index
    %c0_60 = arith.constant 0 : index
    %227 = vector.load %arg12[%c32, %c0_60] : memref<64x32xf32, #tpu.memory_space<vmem>>, vector<32x32xf32>
    %c0_61 = arith.constant 0 : index
    %c0_62 = arith.constant 0 : index
    %228 = vector.load %arg8[%c0_61, %c0_62] : memref<64x128xf32, #tpu.memory_space<vmem>>, vector<32x128xf32>
    %cst_63 = arith.constant dense<0.000000e+00> : vector<32x128xf32>
    %229 = tpu.matmul %227, %228, %cst_63 {dimension_numbers = #tpu.dot_dimension_numbers<[1], [0], [0], [1], [0, 0, 1, 1], [], []>} : vector<32x32xf32>, vector<32x128xf32>, vector<32x128xf32> -> vector<32x128xf32>
    %c0_64 = arith.constant 0 : index
    %c0_65 = arith.constant 0 : index
    %230 = vector.load %arg14[%c0_64, %c0_65] : memref<32x128xf32, #tpu.memory_space<vmem>>, vector<32x128xf32>
    tpu.vector_store %arg14[%c0_64, %c0_65], %229 {strides = array<i32>} : memref<32x128xf32, #tpu.memory_space<vmem>>, vector<32x128xf32>,
    %c0_66 = arith.constant 0 : index
    %c0_67 = arith.constant 0 : index
    %231 = vector.load %arg5[%c0_66, %c0_67] : memref<32x128xf32, #tpu.memory_space<vmem>>, vector<32x128xf32>
    %c0_68 = arith.constant 0 : index
    %c0_69 = arith.constant 0 : index
    %232 = vector.load %arg6[%c0_68, %c0_69] : memref<32x128xf32, #tpu.memory_space<vmem>>, vector<32x128xf32>
    %c0_70 = arith.constant 0 : index
    %c0_71 = arith.constant 0 : index
    %233 = vector.load %arg7[%c0_70, %c0_71] : memref<1x128xf32, #tpu.memory_space<vmem>>, vector<1x128xf32>
    %cst_72 = arith.constant 0.000000e+00 : f32
    %234 = vector.broadcast %cst_72 : f32 to vector<8x32xf32>
    %cst_73 = arith.constant 0.000000e+00 : f32
    %235 = vector.broadcast %cst_73 : f32 to vector<8x32xf32>
    %c0_74 = arith.constant 0 : index
    %c0_75 = arith.constant 0 : index
    %236 = vector.load %arg12[%c0_74, %c0_75] : memref<64x32xf32, #tpu.memory_space<vmem>>, vector<64x32xf32>
    %cst_76 = arith.constant dense<0.000000e+00> : vector<64x128xf32>
    %237 = tpu.matmul %236, %231, %cst_76 {dimension_numbers = #tpu.dot_dimension_numbers<[1], [0], [0], [1], [0, 0, 1, 1], [], []>} : vector<64x32xf32>, vector<32x128xf32>, vector<64x128xf32> -> vector<64x128xf32>
    %238 = vector.broadcast %233 : vector<1x128xf32> to vector<64x128xf32>
    %239 = arith.addf %237, %238 : vector<64x128xf32>
    %c0_77 = arith.constant 0 : index
    %c0_78 = arith.constant 0 : index
    %240 = vector.load %arg11[%c0_77, %c0_78] : memref<64x128xf32, #tpu.memory_space<vmem>>, vector<64x128xf32>
    tpu.vector_store %arg11[%c0_77, %c0_78], %239 {strides = array<i32>} : memref<64x128xf32, #tpu.memory_space<vmem>>, vector<64x128xf32>,
    %c0_i32_79 = arith.constant 0 : i32
    %c64_i32_80 = arith.constant 64 : i32
    %241 = arith.muli %c0_i32_79, %c64_i32_80 : i32
    %c0_i32_81 = arith.constant 0 : i32
    %242 = arith.addi %241, %c0_i32_81 : i32
    %243 = tpu.assume_multiple %242, 8 : i32
    %244 = arith.index_cast %243 : i32 to index
    %c0_82 = arith.constant 0 : index
    %245 = vector.load %arg11[%244, %c0_82] : memref<64x128xf32, #tpu.memory_space<vmem>>, vector<8x128xf32>
    %cst_83 = arith.constant dense<0.000000e+00> : vector<8x128xf32>
    %246 = tpu.matmul %234, %232, %cst_83 {dimension_numbers = #tpu.dot_dimension_numbers<[1], [0], [0], [1], [0, 0, 1, 1], [], []>} : vector<8x32xf32>, vector<32x128xf32>, vector<8x128xf32> -> vector<8x128xf32>
    %247 = arith.addf %245, %246 : vector<8x128xf32>
    %248 = vector.extract_strided_slice %247 {offsets = [0, 0], sizes = [8, 96], strides = [1, 1]} : vector<8x128xf32> to vector<8x96xf32>
    %249 = arith.negf %248 : vector<8x96xf32>
    %250 = math.exp %249 : vector<8x96xf32>
    %cst_84 = arith.constant 1.000000e+00 : f32
    %251 = vector.broadcast %cst_84 : f32 to vector<8x96xf32>
    %252 = arith.addf %251, %250 : vector<8x96xf32>
    %253 = arith.divf %251, %252 : vector<8x96xf32>
    %254 = vector.extract_strided_slice %247 {offsets = [0, 96], sizes = [8, 32], strides = [1, 1]} : vector<8x128xf32> to vector<8x32xf32>
    %255 = math.tanh %254 : vector<8x32xf32>
    %256 = vector.extract_strided_slice %253 {offsets = [0, 0], sizes = [8, 32], strides = [1, 1]} : vector<8x96xf32> to vector<8x32xf32>
    %257 = vector.extract_strided_slice %253 {offsets = [0, 32], sizes = [8, 32], strides = [1, 1]} : vector<8x96xf32> to vector<8x32xf32>
    %258 = vector.extract_strided_slice %253 {offsets = [0, 64], sizes = [8, 32], strides = [1, 1]} : vector<8x96xf32> to vector<8x32xf32>
    %259 = arith.mulf %257, %235 : vector<8x32xf32>
    %260 = arith.mulf %256, %255 : vector<8x32xf32>
    %261 = arith.addf %259, %260 : vector<8x32xf32>
    %262 = math.tanh %261 : vector<8x32xf32>
    %263 = arith.mulf %258, %262 : vector<8x32xf32>
    %c0_i32_85 = arith.constant 0 : i32
    %264 = arith.addi %c0_i32_85, %242 : i32
    %265 = tpu.assume_multiple %264, 8 : i32
    %266 = arith.index_cast %265 : i32 to index
    %c0_86 = arith.constant 0 : index
    %267 = vector.load %arg13[%266, %c0_86] : memref<64x32xf32, #tpu.memory_space<vmem>>, vector<8x32xf32>
    tpu.vector_store %arg13[%266, %c0_86], %263 {strides = array<i32>} : memref<64x32xf32, #tpu.memory_space<vmem>>, vector<8x32xf32>,
    %c64_i32_87 = arith.constant 64 : i32
    %268 = arith.muli %c0_i32_79, %c64_i32_87 : i32
    %c8_i32_88 = arith.constant 8 : i32
    %269 = arith.addi %268, %c8_i32_88 : i32
    %270 = tpu.assume_multiple %269, 8 : i32
    %271 = arith.index_cast %270 : i32 to index
    %c0_89 = arith.constant 0 : index
    %272 = vector.load %arg11[%271, %c0_89] : memref<64x128xf32, #tpu.memory_space<vmem>>, vector<8x128xf32>
    %cst_90 = arith.constant dense<0.000000e+00> : vector<8x128xf32>
    %273 = tpu.matmul %263, %232, %cst_90 {dimension_numbers = #tpu.dot_dimension_numbers<[1], [0], [0], [1], [0, 0, 1, 1], [], []>} : vector<8x32xf32>, vector<32x128xf32>, vector<8x128xf32> -> vector<8x128xf32>
    %274 = arith.addf %272, %273 : vector<8x128xf32>
    %275 = vector.extract_strided_slice %274 {offsets = [0, 0], sizes = [8, 96], strides = [1, 1]} : vector<8x128xf32> to vector<8x96xf32>
    %276 = arith.negf %275 : vector<8x96xf32>
    %277 = math.exp %276 : vector<8x96xf32>
    %cst_91 = arith.constant 1.000000e+00 : f32
    %278 = vector.broadcast %cst_91 : f32 to vector<8x96xf32>
    %279 = arith.addf %278, %277 : vector<8x96xf32>
    %280 = arith.divf %278, %279 : vector<8x96xf32>
    %281 = vector.extract_strided_slice %274 {offsets = [0, 96], sizes = [8, 32], strides = [1, 1]} : vector<8x128xf32> to vector<8x32xf32>
    %282 = math.tanh %281 : vector<8x32xf32>
    %283 = vector.extract_strided_slice %280 {offsets = [0, 0], sizes = [8, 32], strides = [1, 1]} : vector<8x96xf32> to vector<8x32xf32>
    %284 = vector.extract_strided_slice %280 {offsets = [0, 32], sizes = [8, 32], strides = [1, 1]} : vector<8x96xf32> to vector<8x32xf32>
    %285 = vector.extract_strided_slice %280 {offsets = [0, 64], sizes = [8, 32], strides = [1, 1]} : vector<8x96xf32> to vector<8x32xf32>
    %286 = arith.mulf %284, %261 : vector<8x32xf32>
    %287 = arith.mulf %283, %282 : vector<8x32xf32>
    %288 = arith.addf %286, %287 : vector<8x32xf32>
    %289 = math.tanh %288 : vector<8x32xf32>
    %290 = arith.mulf %285, %289 : vector<8x32xf32>
    %c0_i32_92 = arith.constant 0 : i32
    %291 = arith.addi %c0_i32_92, %269 : i32
    %292 = tpu.assume_multiple %291, 8 : i32
    %293 = arith.index_cast %292 : i32 to index
    %c0_93 = arith.constant 0 : index
    %294 = vector.load %arg13[%293, %c0_93] : memref<64x32xf32, #tpu.memory_space<vmem>>, vector<8x32xf32>
    tpu.vector_store %arg13[%293, %c0_93], %290 {strides = array<i32>} : memref<64x32xf32, #tpu.memory_space<vmem>>, vector<8x32xf32>,
    %c64_i32_94 = arith.constant 64 : i32
    %295 = arith.muli %c0_i32_79, %c64_i32_94 : i32
    %c16_i32_95 = arith.constant 16 : i32
    %296 = arith.addi %295, %c16_i32_95 : i32
    %297 = tpu.assume_multiple %296, 8 : i32
    %298 = arith.index_cast %297 : i32 to index
    %c0_96 = arith.constant 0 : index
    %299 = vector.load %arg11[%298, %c0_96] : memref<64x128xf32, #tpu.memory_space<vmem>>, vector<8x128xf32>
    %cst_97 = arith.constant dense<0.000000e+00> : vector<8x128xf32>
    %300 = tpu.matmul %290, %232, %cst_97 {dimension_numbers = #tpu.dot_dimension_numbers<[1], [0], [0], [1], [0, 0, 1, 1], [], []>} : vector<8x32xf32>, vector<32x128xf32>, vector<8x128xf32> -> vector<8x128xf32>
    %301 = arith.addf %299, %300 : vector<8x128xf32>
    %302 = vector.extract_strided_slice %301 {offsets = [0, 0], sizes = [8, 96], strides = [1, 1]} : vector<8x128xf32> to vector<8x96xf32>
    %303 = arith.negf %302 : vector<8x96xf32>
    %304 = math.exp %303 : vector<8x96xf32>
    %cst_98 = arith.constant 1.000000e+00 : f32
    %305 = vector.broadcast %cst_98 : f32 to vector<8x96xf32>
    %306 = arith.addf %305, %304 : vector<8x96xf32>
    %307 = arith.divf %305, %306 : vector<8x96xf32>
    %308 = vector.extract_strided_slice %301 {offsets = [0, 96], sizes = [8, 32], strides = [1, 1]} : vector<8x128xf32> to vector<8x32xf32>
    %309 = math.tanh %308 : vector<8x32xf32>
    %310 = vector.extract_strided_slice %307 {offsets = [0, 0], sizes = [8, 32], strides = [1, 1]} : vector<8x96xf32> to vector<8x32xf32>
    %311 = vector.extract_strided_slice %307 {offsets = [0, 32], sizes = [8, 32], strides = [1, 1]} : vector<8x96xf32> to vector<8x32xf32>
    %312 = vector.extract_strided_slice %307 {offsets = [0, 64], sizes = [8, 32], strides = [1, 1]} : vector<8x96xf32> to vector<8x32xf32>
    %313 = arith.mulf %311, %288 : vector<8x32xf32>
    %314 = arith.mulf %310, %309 : vector<8x32xf32>
    %315 = arith.addf %313, %314 : vector<8x32xf32>
    %316 = math.tanh %315 : vector<8x32xf32>
    %317 = arith.mulf %312, %316 : vector<8x32xf32>
    %c0_i32_99 = arith.constant 0 : i32
    %318 = arith.addi %c0_i32_99, %296 : i32
    %319 = tpu.assume_multiple %318, 8 : i32
    %320 = arith.index_cast %319 : i32 to index
    %c0_100 = arith.constant 0 : index
    %321 = vector.load %arg13[%320, %c0_100] : memref<64x32xf32, #tpu.memory_space<vmem>>, vector<8x32xf32>
    tpu.vector_store %arg13[%320, %c0_100], %317 {strides = array<i32>} : memref<64x32xf32, #tpu.memory_space<vmem>>, vector<8x32xf32>,
    %c64_i32_101 = arith.constant 64 : i32
    %322 = arith.muli %c0_i32_79, %c64_i32_101 : i32
    %c24_i32_102 = arith.constant 24 : i32
    %323 = arith.addi %322, %c24_i32_102 : i32
    %324 = tpu.assume_multiple %323, 8 : i32
    %325 = arith.index_cast %324 : i32 to index
    %c0_103 = arith.constant 0 : index
    %326 = vector.load %arg11[%325, %c0_103] : memref<64x128xf32, #tpu.memory_space<vmem>>, vector<8x128xf32>
    %cst_104 = arith.constant dense<0.000000e+00> : vector<8x128xf32>
    %327 = tpu.matmul %317, %232, %cst_104 {dimension_numbers = #tpu.dot_dimension_numbers<[1], [0], [0], [1], [0, 0, 1, 1], [], []>} : vector<8x32xf32>, vector<32x128xf32>, vector<8x128xf32> -> vector<8x128xf32>
    %328 = arith.addf %326, %327 : vector<8x128xf32>
    %329 = vector.extract_strided_slice %328 {offsets = [0, 0], sizes = [8, 96], strides = [1, 1]} : vector<8x128xf32> to vector<8x96xf32>
    %330 = arith.negf %329 : vector<8x96xf32>
    %331 = math.exp %330 : vector<8x96xf32>
    %cst_105 = arith.constant 1.000000e+00 : f32
    %332 = vector.broadcast %cst_105 : f32 to vector<8x96xf32>
    %333 = arith.addf %332, %331 : vector<8x96xf32>
    %334 = arith.divf %332, %333 : vector<8x96xf32>
    %335 = vector.extract_strided_slice %328 {offsets = [0, 96], sizes = [8, 32], strides = [1, 1]} : vector<8x128xf32> to vector<8x32xf32>
    %336 = math.tanh %335 : vector<8x32xf32>
    %337 = vector.extract_strided_slice %334 {offsets = [0, 0], sizes = [8, 32], strides = [1, 1]} : vector<8x96xf32> to vector<8x32xf32>
    %338 = vector.extract_strided_slice %334 {offsets = [0, 32], sizes = [8, 32], strides = [1, 1]} : vector<8x96xf32> to vector<8x32xf32>
    %339 = vector.extract_strided_slice %334 {offsets = [0, 64], sizes = [8, 32], strides = [1, 1]} : vector<8x96xf32> to vector<8x32xf32>
    %340 = arith.mulf %338, %315 : vector<8x32xf32>
    %341 = arith.mulf %337, %336 : vector<8x32xf32>
    %342 = arith.addf %340, %341 : vector<8x32xf32>
    %343 = math.tanh %342 : vector<8x32xf32>
    %344 = arith.mulf %339, %343 : vector<8x32xf32>
    %c0_i32_106 = arith.constant 0 : i32
    %345 = arith.addi %c0_i32_106, %323 : i32
    %346 = tpu.assume_multiple %345, 8 : i32
    %347 = arith.index_cast %346 : i32 to index
    %c0_107 = arith.constant 0 : index
    %348 = vector.load %arg13[%347, %c0_107] : memref<64x32xf32, #tpu.memory_space<vmem>>, vector<8x32xf32>
    tpu.vector_store %arg13[%347, %c0_107], %344 {strides = array<i32>} : memref<64x32xf32, #tpu.memory_space<vmem>>, vector<8x32xf32>,
    %c64_i32_108 = arith.constant 64 : i32
    %349 = arith.muli %c0_i32_79, %c64_i32_108 : i32
    %c32_i32_109 = arith.constant 32 : i32
    %350 = arith.addi %349, %c32_i32_109 : i32
    %351 = tpu.assume_multiple %350, 8 : i32
    %352 = arith.index_cast %351 : i32 to index
    %c0_110 = arith.constant 0 : index
    %353 = vector.load %arg11[%352, %c0_110] : memref<64x128xf32, #tpu.memory_space<vmem>>, vector<8x128xf32>
    %cst_111 = arith.constant dense<0.000000e+00> : vector<8x128xf32>
    %354 = tpu.matmul %344, %232, %cst_111 {dimension_numbers = #tpu.dot_dimension_numbers<[1], [0], [0], [1], [0, 0, 1, 1], [], []>} : vector<8x32xf32>, vector<32x128xf32>, vector<8x128xf32> -> vector<8x128xf32>
    %355 = arith.addf %353, %354 : vector<8x128xf32>
    %356 = vector.extract_strided_slice %355 {offsets = [0, 0], sizes = [8, 96], strides = [1, 1]} : vector<8x128xf32> to vector<8x96xf32>
    %357 = arith.negf %356 : vector<8x96xf32>
    %358 = math.exp %357 : vector<8x96xf32>
    %cst_112 = arith.constant 1.000000e+00 : f32
    %359 = vector.broadcast %cst_112 : f32 to vector<8x96xf32>
    %360 = arith.addf %359, %358 : vector<8x96xf32>
    %361 = arith.divf %359, %360 : vector<8x96xf32>
    %362 = vector.extract_strided_slice %355 {offsets = [0, 96], sizes = [8, 32], strides = [1, 1]} : vector<8x128xf32> to vector<8x32xf32>
    %363 = math.tanh %362 : vector<8x32xf32>
    %364 = vector.extract_strided_slice %361 {offsets = [0, 0], sizes = [8, 32], strides = [1, 1]} : vector<8x96xf32> to vector<8x32xf32>
    %365 = vector.extract_strided_slice %361 {offsets = [0, 32], sizes = [8, 32], strides = [1, 1]} : vector<8x96xf32> to vector<8x32xf32>
    %366 = vector.extract_strided_slice %361 {offsets = [0, 64], sizes = [8, 32], strides = [1, 1]} : vector<8x96xf32> to vector<8x32xf32>
    %367 = arith.mulf %365, %342 : vector<8x32xf32>
    %368 = arith.mulf %364, %363 : vector<8x32xf32>
    %369 = arith.addf %367, %368 : vector<8x32xf32>
    %370 = math.tanh %369 : vector<8x32xf32>
    %371 = arith.mulf %366, %370 : vector<8x32xf32>
    %c0_i32_113 = arith.constant 0 : i32
    %372 = arith.addi %c0_i32_113, %350 : i32
    %373 = tpu.assume_multiple %372, 8 : i32
    %374 = arith.index_cast %373 : i32 to index
    %c0_114 = arith.constant 0 : index
    %375 = vector.load %arg13[%374, %c0_114] : memref<64x32xf32, #tpu.memory_space<vmem>>, vector<8x32xf32>
    tpu.vector_store %arg13[%374, %c0_114], %371 {strides = array<i32>} : memref<64x32xf32, #tpu.memory_space<vmem>>, vector<8x32xf32>,
    %c64_i32_115 = arith.constant 64 : i32
    %376 = arith.muli %c0_i32_79, %c64_i32_115 : i32
    %c40_i32_116 = arith.constant 40 : i32
    %377 = arith.addi %376, %c40_i32_116 : i32
    %378 = tpu.assume_multiple %377, 8 : i32
    %379 = arith.index_cast %378 : i32 to index
    %c0_117 = arith.constant 0 : index
    %380 = vector.load %arg11[%379, %c0_117] : memref<64x128xf32, #tpu.memory_space<vmem>>, vector<8x128xf32>
    %cst_118 = arith.constant dense<0.000000e+00> : vector<8x128xf32>
    %381 = tpu.matmul %371, %232, %cst_118 {dimension_numbers = #tpu.dot_dimension_numbers<[1], [0], [0], [1], [0, 0, 1, 1], [], []>} : vector<8x32xf32>, vector<32x128xf32>, vector<8x128xf32> -> vector<8x128xf32>
    %382 = arith.addf %380, %381 : vector<8x128xf32>
    %383 = vector.extract_strided_slice %382 {offsets = [0, 0], sizes = [8, 96], strides = [1, 1]} : vector<8x128xf32> to vector<8x96xf32>
    %384 = arith.negf %383 : vector<8x96xf32>
    %385 = math.exp %384 : vector<8x96xf32>
    %cst_119 = arith.constant 1.000000e+00 : f32
    %386 = vector.broadcast %cst_119 : f32 to vector<8x96xf32>
    %387 = arith.addf %386, %385 : vector<8x96xf32>
    %388 = arith.divf %386, %387 : vector<8x96xf32>
    %389 = vector.extract_strided_slice %382 {offsets = [0, 96], sizes = [8, 32], strides = [1, 1]} : vector<8x128xf32> to vector<8x32xf32>
    %390 = math.tanh %389 : vector<8x32xf32>
    %391 = vector.extract_strided_slice %388 {offsets = [0, 0], sizes = [8, 32], strides = [1, 1]} : vector<8x96xf32> to vector<8x32xf32>
    %392 = vector.extract_strided_slice %388 {offsets = [0, 32], sizes = [8, 32], strides = [1, 1]} : vector<8x96xf32> to vector<8x32xf32>
    %393 = vector.extract_strided_slice %388 {offsets = [0, 64], sizes = [8, 32], strides = [1, 1]} : vector<8x96xf32> to vector<8x32xf32>
    %394 = arith.mulf %392, %369 : vector<8x32xf32>
    %395 = arith.mulf %391, %390 : vector<8x32xf32>
    %396 = arith.addf %394, %395 : vector<8x32xf32>
    %397 = math.tanh %396 : vector<8x32xf32>
    %398 = arith.mulf %393, %397 : vector<8x32xf32>
    %c0_i32_120 = arith.constant 0 : i32
    %399 = arith.addi %c0_i32_120, %377 : i32
    %400 = tpu.assume_multiple %399, 8 : i32
    %401 = arith.index_cast %400 : i32 to index
    %c0_121 = arith.constant 0 : index
    %402 = vector.load %arg13[%401, %c0_121] : memref<64x32xf32, #tpu.memory_space<vmem>>, vector<8x32xf32>
    tpu.vector_store %arg13[%401, %c0_121], %398 {strides = array<i32>} : memref<64x32xf32, #tpu.memory_space<vmem>>, vector<8x32xf32>,
    %c64_i32_122 = arith.constant 64 : i32
    %403 = arith.muli %c0_i32_79, %c64_i32_122 : i32
    %c48_i32_123 = arith.constant 48 : i32
    %404 = arith.addi %403, %c48_i32_123 : i32
    %405 = tpu.assume_multiple %404, 8 : i32
    %406 = arith.index_cast %405 : i32 to index
    %c0_124 = arith.constant 0 : index
    %407 = vector.load %arg11[%406, %c0_124] : memref<64x128xf32, #tpu.memory_space<vmem>>, vector<8x128xf32>
    %cst_125 = arith.constant dense<0.000000e+00> : vector<8x128xf32>
    %408 = tpu.matmul %398, %232, %cst_125 {dimension_numbers = #tpu.dot_dimension_numbers<[1], [0], [0], [1], [0, 0, 1, 1], [], []>} : vector<8x32xf32>, vector<32x128xf32>, vector<8x128xf32> -> vector<8x128xf32>
    %409 = arith.addf %407, %408 : vector<8x128xf32>
    %410 = vector.extract_strided_slice %409 {offsets = [0, 0], sizes = [8, 96], strides = [1, 1]} : vector<8x128xf32> to vector<8x96xf32>
    %411 = arith.negf %410 : vector<8x96xf32>
    %412 = math.exp %411 : vector<8x96xf32>
    %cst_126 = arith.constant 1.000000e+00 : f32
    %413 = vector.broadcast %cst_126 : f32 to vector<8x96xf32>
    %414 = arith.addf %413, %412 : vector<8x96xf32>
    %415 = arith.divf %413, %414 : vector<8x96xf32>
    %416 = vector.extract_strided_slice %409 {offsets = [0, 96], sizes = [8, 32], strides = [1, 1]} : vector<8x128xf32> to vector<8x32xf32>
    %417 = math.tanh %416 : vector<8x32xf32>
    %418 = vector.extract_strided_slice %415 {offsets = [0, 0], sizes = [8, 32], strides = [1, 1]} : vector<8x96xf32> to vector<8x32xf32>
    %419 = vector.extract_strided_slice %415 {offsets = [0, 32], sizes = [8, 32], strides = [1, 1]} : vector<8x96xf32> to vector<8x32xf32>
    %420 = vector.extract_strided_slice %415 {offsets = [0, 64], sizes = [8, 32], strides = [1, 1]} : vector<8x96xf32> to vector<8x32xf32>
    %421 = arith.mulf %419, %396 : vector<8x32xf32>
    %422 = arith.mulf %418, %417 : vector<8x32xf32>
    %423 = arith.addf %421, %422 : vector<8x32xf32>
    %424 = math.tanh %423 : vector<8x32xf32>
    %425 = arith.mulf %420, %424 : vector<8x32xf32>
    %c0_i32_127 = arith.constant 0 : i32
    %426 = arith.addi %c0_i32_127, %404 : i32
    %427 = tpu.assume_multiple %426, 8 : i32
    %428 = arith.index_cast %427 : i32 to index
    %c0_128 = arith.constant 0 : index
    %429 = vector.load %arg13[%428, %c0_128] : memref<64x32xf32, #tpu.memory_space<vmem>>, vector<8x32xf32>
    tpu.vector_store %arg13[%428, %c0_128], %425 {strides = array<i32>} : memref<64x32xf32, #tpu.memory_space<vmem>>, vector<8x32xf32>,
    %c64_i32_129 = arith.constant 64 : i32
    %430 = arith.muli %c0_i32_79, %c64_i32_129 : i32
    %c56_i32_130 = arith.constant 56 : i32
    %431 = arith.addi %430, %c56_i32_130 : i32
    %432 = tpu.assume_multiple %431, 8 : i32
    %433 = arith.index_cast %432 : i32 to index
    %c0_131 = arith.constant 0 : index
    %434 = vector.load %arg11[%433, %c0_131] : memref<64x128xf32, #tpu.memory_space<vmem>>, vector<8x128xf32>
    %cst_132 = arith.constant dense<0.000000e+00> : vector<8x128xf32>
    %435 = tpu.matmul %425, %232, %cst_132 {dimension_numbers = #tpu.dot_dimension_numbers<[1], [0], [0], [1], [0, 0, 1, 1], [], []>} : vector<8x32xf32>, vector<32x128xf32>, vector<8x128xf32> -> vector<8x128xf32>
    %436 = arith.addf %434, %435 : vector<8x128xf32>
    %437 = vector.extract_strided_slice %436 {offsets = [0, 0], sizes = [8, 96], strides = [1, 1]} : vector<8x128xf32> to vector<8x96xf32>
    %438 = arith.negf %437 : vector<8x96xf32>
    %439 = math.exp %438 : vector<8x96xf32>
    %cst_133 = arith.constant 1.000000e+00 : f32
    %440 = vector.broadcast %cst_133 : f32 to vector<8x96xf32>
    %441 = arith.addf %440, %439 : vector<8x96xf32>
    %442 = arith.divf %440, %441 : vector<8x96xf32>
    %443 = vector.extract_strided_slice %436 {offsets = [0, 96], sizes = [8, 32], strides = [1, 1]} : vector<8x128xf32> to vector<8x32xf32>
    %444 = math.tanh %443 : vector<8x32xf32>
    %445 = vector.extract_strided_slice %442 {offsets = [0, 0], sizes = [8, 32], strides = [1, 1]} : vector<8x96xf32> to vector<8x32xf32>
    %446 = vector.extract_strided_slice %442 {offsets = [0, 32], sizes = [8, 32], strides = [1, 1]} : vector<8x96xf32> to vector<8x32xf32>
    %447 = vector.extract_strided_slice %442 {offsets = [0, 64], sizes = [8, 32], strides = [1, 1]} : vector<8x96xf32> to vector<8x32xf32>
    %448 = arith.mulf %446, %423 : vector<8x32xf32>
    %449 = arith.mulf %445, %444 : vector<8x32xf32>
    %450 = arith.addf %448, %449 : vector<8x32xf32>
    %451 = math.tanh %450 : vector<8x32xf32>
    %452 = arith.mulf %447, %451 : vector<8x32xf32>
    %c0_i32_134 = arith.constant 0 : i32
    %453 = arith.addi %c0_i32_134, %431 : i32
    %454 = tpu.assume_multiple %453, 8 : i32
    %455 = arith.index_cast %454 : i32 to index
    %c0_135 = arith.constant 0 : index
    %456 = vector.load %arg13[%455, %c0_135] : memref<64x32xf32, #tpu.memory_space<vmem>>, vector<8x32xf32>
    tpu.vector_store %arg13[%455, %c0_135], %452 {strides = array<i32>} : memref<64x32xf32, #tpu.memory_space<vmem>>, vector<8x32xf32>,
    %c1_i32_136 = arith.constant 1 : i32
    %c32_137 = arith.constant 32 : index
    %c0_138 = arith.constant 0 : index
    %457 = vector.load %arg13[%c32_137, %c0_138] : memref<64x32xf32, #tpu.memory_space<vmem>>, vector<32x32xf32>
    %c32_139 = arith.constant 32 : index
    %c0_140 = arith.constant 0 : index
    %458 = vector.load %arg8[%c32_139, %c0_140] : memref<64x128xf32, #tpu.memory_space<vmem>>, vector<32x128xf32>
    %cst_141 = arith.constant dense<0.000000e+00> : vector<32x128xf32>
    %459 = tpu.matmul %457, %458, %cst_141 {dimension_numbers = #tpu.dot_dimension_numbers<[1], [0], [0], [1], [0, 0, 1, 1], [], []>} : vector<32x32xf32>, vector<32x128xf32>, vector<32x128xf32> -> vector<32x128xf32>
    %c0_142 = arith.constant 0 : index
    %c0_143 = arith.constant 0 : index
    %460 = vector.load %arg14[%c0_142, %c0_143] : memref<32x128xf32, #tpu.memory_space<vmem>>, vector<32x128xf32>
    %461 = arith.addf %460, %459 : vector<32x128xf32>
    %c0_144 = arith.constant 0 : index
    %c0_145 = arith.constant 0 : index
    %462 = vector.load %arg14[%c0_144, %c0_145] : memref<32x128xf32, #tpu.memory_space<vmem>>, vector<32x128xf32>
    tpu.vector_store %arg14[%c0_144, %c0_145], %461 {strides = array<i32>} : memref<32x128xf32, #tpu.memory_space<vmem>>, vector<32x128xf32>,
    %c0_146 = arith.constant 0 : index
    %c0_147 = arith.constant 0 : index
    %463 = vector.load %arg14[%c0_146, %c0_147] : memref<32x128xf32, #tpu.memory_space<vmem>>, vector<32x128xf32>
    %c0_148 = arith.constant 0 : index
    %c0_149 = arith.constant 0 : index
    %464 = vector.load %arg9[%c0_148, %c0_149] : memref<1x128xf32, #tpu.memory_space<vmem>>, vector<1x128xf32>
    %465 = vector.broadcast %464 : vector<1x128xf32> to vector<32x128xf32>
    %466 = arith.addf %463, %465 : vector<32x128xf32>
    %467 = tpu.iota {dimensions = array<i32: 1>} : vector<32x128xi32>
    %c2_i32 = arith.constant 2 : i32
    %468 = vector.broadcast %c2_i32 : i32 to vector<32x128xi32>
    %469 = arith.cmpi slt, %467, %468 : vector<32x128xi32>
    %cst_150 = arith.constant 0.000000e+00 : f32
    %470 = vector.broadcast %cst_150 : f32 to vector<32x128xf32>
    %471 = arith.maximumf %466, %470 : vector<32x128xf32>
    %472 = vector.broadcast %cst_150 : f32 to vector<32x128xf32>
    %473 = arith.subf %466, %472 : vector<32x128xf32>
    %474 = arith.cmpf one, %473, %473 : vector<32x128xf32>
    %475 = vector.broadcast %cst_150 : f32 to vector<32x128xf32>
    %476 = arith.addf %466, %475 : vector<32x128xf32>
    %477 = math.absf %473 : vector<32x128xf32>
    %cst_151 = arith.constant 0.000000e+00 : f32
    %478 = vector.broadcast %cst_151 : f32 to vector<32x128xf32>
    %479 = arith.subf %478, %477 : vector<32x128xf32>
    %480 = math.exp %479 : vector<32x128xf32>
    %481 = math.log1p %480 : vector<32x128xf32>
    %482 = arith.addf %471, %481 : vector<32x128xf32>
    %483 = arith.select %474, %476, %482 : vector<32x128xi1>, vector<32x128xf32>
    %cst_152 = arith.constant 9.99999997E-7 : f32
    %484 = vector.broadcast %cst_152 : f32 to vector<32x128xf32>
    %485 = arith.addf %483, %484 : vector<32x128xf32>
    %486 = arith.select %469, %466, %485 : vector<32x128xi1>, vector<32x128xf32>
    %487 = vector.shape_cast %486 : vector<32x128xf32> to vector<4x8x128xf32>
    %c0_153 = arith.constant 0 : index
    %c0_154 = arith.constant 0 : index
    %c0_155 = arith.constant 0 : index
    %488 = vector.load %arg10[%c0_153, %c0_154, %c0_155] : memref<4x8x128xf32, #tpu.memory_space<vmem>>, vector<4x8x128xf32>
    tpu.vector_store %arg10[%c0_153, %c0_154, %c0_155], %487 {strides = array<i32>} : memref<4x8x128xf32, #tpu.memory_space<vmem>>, vector<4x8x128xf32>,
    return
  }
  func.func @transform_0(%arg0: i32) -> (i32, i32, i32) {
    %c0_i32 = arith.constant 0 : i32
    %c0_i32_0 = arith.constant 0 : i32
    %c0_i32_1 = arith.constant 0 : i32
    return %c0_i32, %arg0, %c0_i32_0 : i32, i32, i32
  }
  func.func @transform_1(%arg0: i32) -> (i32, i32) {
    %c0_i32 = arith.constant 0 : i32
    %c0_i32_0 = arith.constant 0 : i32
    %c0_i32_1 = arith.constant 0 : i32
    return %c0_i32, %c0_i32_0 : i32, i32
  }
  func.func @transform_2(%arg0: i32) -> (i32, i32) {
    %c0_i32 = arith.constant 0 : i32
    %c0_i32_0 = arith.constant 0 : i32
    %c0_i32_1 = arith.constant 0 : i32
    return %c0_i32, %c0_i32_0 : i32, i32
  }
  func.func @transform_3(%arg0: i32) -> (i32, i32) {
    %c0_i32 = arith.constant 0 : i32
    %c0_i32_0 = arith.constant 0 : i32
    %c0_i32_1 = arith.constant 0 : i32
    return %c0_i32, %c0_i32_0 : i32, i32
  }
  func.func @transform_4(%arg0: i32) -> (i32, i32) {
    %c0_i32 = arith.constant 0 : i32
    %c0_i32_0 = arith.constant 0 : i32
    %c0_i32_1 = arith.constant 0 : i32
    return %c0_i32, %c0_i32_0 : i32, i32
  }
  func.func @transform_5(%arg0: i32) -> (i32, i32) {
    %c0_i32 = arith.constant 0 : i32
    %c0_i32_0 = arith.constant 0 : i32
    %c0_i32_1 = arith.constant 0 : i32
    return %c0_i32, %c0_i32_0 : i32, i32
  }
  func.func @transform_6(%arg0: i32) -> (i32, i32) {
    %c0_i32 = arith.constant 0 : i32
    %c0_i32_0 = arith.constant 0 : i32
    %c0_i32_1 = arith.constant 0 : i32
    return %c0_i32, %c0_i32_0 : i32, i32
  }
  func.func @transform_7(%arg0: i32) -> (i32, i32) {
    %c0_i32 = arith.constant 0 : i32
    %c0_i32_0 = arith.constant 0 : i32
    %c0_i32_1 = arith.constant 0 : i32
    return %c0_i32, %c0_i32_0 : i32, i32
  }
  func.func @transform_8(%arg0: i32) -> (i32, i32) {
    %c0_i32 = arith.constant 0 : i32
    %c0_i32_0 = arith.constant 0 : i32
    %c0_i32_1 = arith.constant 0 : i32
    return %c0_i32, %c0_i32_0 : i32, i32
  }
  func.func @transform_9(%arg0: i32) -> (i32, i32, i32) {
    %c0_i32 = arith.constant 0 : i32
    %c0_i32_0 = arith.constant 0 : i32
    %c0_i32_1 = arith.constant 0 : i32
    return %c0_i32, %arg0, %c0_i32_0 : i32, i32, i32
  }
}

</mosaic_0001>

<bundles_post_ra>
// kernel: tpu_custom_call.1
= control target key start
LH: loop header
LB: loop body
LE: loop exit
PB: predicated region body
PF: predicated region fallthrough
CT: control target
= control target key end

     0   :  { %14 = vsyncpa [#allocation7], 0  ;;  %s2414_s0 = inlined_call_operand.hbm [shape: f32[8,8,10], index: 0, kind: input, shape index: {}]   ;;  %s2415_s1 = inlined_call_operand.hbm [shape: f32[10,128], index: 1, kind: input, shape index: {}]   ;;  %s2416_s2 = inlined_call_operand.hbm [shape: f32[32,128], index: 2, kind: input, shape index: {}]   ;;  %s2417_s3 = inlined_call_operand.vmem [shape: f32[1,128], index: 3, kind: input, shape index: {}]   ;;  %s2418_s4 = inlined_call_operand.hbm [shape: f32[32,128], index: 4, kind: input, shape index: {}]   ;;  %s2419_s5 = inlined_call_operand.hbm [shape: f32[32,128], index: 5, kind: input, shape index: {}]   ;;  %s2420_s6 = inlined_call_operand.vmem [shape: f32[1,128], index: 6, kind: input, shape index: {}]   ;;  %s2421_s7 = inlined_call_operand.hbm [shape: f32[64,128], index: 7, kind: input, shape index: {}]   ;;  %s2422_s8 = inlined_call_operand.vmem [shape: f32[1,128], index: 8, kind: input, shape index: {}]   ;;  %s2423_s9 = inlined_call_operand.hbm [shape: f32[4,8,128], index: 9, kind: output, shape index: {}]  }
   0x1   :  { %15 = vsyncpa [#allocation10], 0 }
   0x2   :  { %16 = vsyncpa [#allocation13], 0 }
   0x3   :  { %17 = vsyncpa [#allocation16], 0 }
   0x4   :  { %18 = vsyncpa [#allocation8], 0  ;;  %s36_s11 = sshll.u32 %s2415_s1, 4  ;;  %s2024_s12 = smov [#allocation9]   ;;  %s37_s11 = int_to_ptr.hbm [resolvable:$true] %s36_s11 }
   0x5   :  { %s38_s13 = sshll.u32 %s2024_s12, 4  ;;  %s64_s16 = sshll.u32 %s2418_s4, 4  ;;  %s39_s13 = int_to_ptr.vmem [resolvable:$true] %s38_s13  ;;  %s65_s16 = int_to_ptr.hbm [resolvable:$true] %s64_s16 }
   0x6   :  { %s2025_s17 = smov 128   ;;  %s2026_s18 = smov 8  }
   0x7   :  { %44 = dma.hbm_to_vmem [thread:$0]  %s37_s11, 256, %s39_s13, [#allocation10], %s2025_s17, %s2025_s17, %s2026_s18  }
   0x8   :  { %s2027_s19 = smov [#allocation12]   ;;  %s23_s1 = sshll.u32 %s2414_s0, 4  ;;  %s24_s1 = int_to_ptr.hbm [resolvable:$true] %s23_s1 }
   0x9   :  { %s66_s20 = sshll.u32 %s2027_s19, 4  ;;  %s49_s24 = sshll.u32 %s2416_s2, 4  ;;  %s67_s20 = int_to_ptr.vmem [resolvable:$true] %s66_s20  ;;  %s50_s24 = int_to_ptr.hbm [resolvable:$true] %s49_s24 }
   0xa   :  { %72 = dma.hbm_to_vmem [thread:$0]  %s65_s16, 512, %s67_s20, [#allocation13], %s2025_s17, %s2025_s17, %s2026_s18  }
   0xb   :  { %s2028_s25 = smov [#allocation6]   ;;  %s2029_s27 = smov [#allocation11]  }
   0xc   :  { %s25_s26 = sshll.u32 %s2028_s25, 4  ;;  %s51_s0 = sshll.u32 %s2029_s27, 4  ;;  %s26_s26 = int_to_ptr.vmem [resolvable:$true] %s25_s26  ;;  %s52_s0 = int_to_ptr.vmem [resolvable:$true] %s51_s0 }
   0xd   :  { %31 = dma.hbm_to_vmem [thread:$0]  %s24_s1, 1024, %s26_s26, [#allocation7], %s2025_s17, %s2025_s17, %s2026_s18  }
   0xe   :  { %s77_s30 = sshll.u32 %s2419_s5, 4  ;;  %s92_s11 = sshll.u32 %s2421_s7, 4  ;;  %s78_s30 = int_to_ptr.hbm [resolvable:$true] %s77_s30  ;;  %s93_s11 = int_to_ptr.hbm [resolvable:$true] %s92_s11 }
   0xf   :  { %57 = dma.hbm_to_vmem [thread:$0]  %s50_s24, 512, %s52_s0, [#allocation10], %s2025_s17, %s2025_s17, %s2026_s18  }
  0x10   :  { %s2030_s12 = smov [#allocation14]   ;;  %s2031_s14 = smov [#allocation15]  }
  0x11   :  { %s79_s13 = sshll.u32 %s2030_s12, 4  ;;  %s94_s5 = sshll.u32 %s2031_s14, 4  ;;  %s80_s13 = int_to_ptr.vmem [resolvable:$true] %s79_s13  ;;  %s95_s5 = int_to_ptr.vmem [resolvable:$true] %s94_s5 }
  0x12   :  { %85 = dma.hbm_to_vmem [thread:$0]  %s78_s30, 512, %s80_s13, [#allocation13], %s2025_s17, %s2025_s17, %s2026_s18  }
  0x13   :  { %100 = dma.hbm_to_vmem [thread:$0]  %s93_s11, 1024, %s95_s5, [#allocation16], %s2025_s17, %s2025_s17, %s2026_s18  }
  0x14   :  { %2014 = dma.done.wait [#allocation7], 1024  }
  0x15   :  { %2015 = vsyncadd [#allocation7], 4294966272 }
  0x16   :  { %2016 = dma.done.wait [#allocation10], 768  }
  0x17   :  { %2017 = vsyncadd [#allocation10], 4294966528 }
  0x18   :  { %2018 = dma.done.wait [#allocation13], 1024  }
  0x19   :  { %2019 = vsyncadd [#allocation13], 4294966272 }
  0x1a   :  { %2020 = dma.done.wait [#allocation16], 1024  }
  0x1b   :  { %2021 = vsyncadd [#allocation16], 4294966272  ;;  %vm170_vm0 = vcmask 1041408   ;;  %v128_v0 = vld [vmem:[#allocation9 + $0x8] sm:$0x3]  ;;  %v127_v1 = vld [vmem:[#allocation9] sm:$0xff] }
  0x1c   :  { %1628 = vmatpush.msk.msra.mxu0 %vm170_vm0, %v128_v0  ;;  %v134_v2 = vld [vmem:[#allocation6] sm:$0xff]  ;;  %vm145_vm1 = vcmask 80896   ;;  %v2122_v3 = vld [vmem:[#allocation11 + $0x18] sm:$0xff]  ;;  %v2132_v5 = vld [vmem:[#allocation11 + $0x8] sm:$0xff]  ;;  %v2032_v14 = vmov 0.0   ;;  %s2034_s16 = smov 64  }
  0x1d   :  { %v2124_v4 = vld [vmem:[#allocation11 + $0x10] sm:$0xff]  ;;  %307 = vmatpush.msra.mxu2 %v2122_v3  ;;  %375 = vmatpush.msra.mxu3 %v2122_v3  ;;  %v135_v6 = vld [vmem:[#allocation6 + $0x8] sm:$0xff]  ;;  %v136_v7 = vld [vmem:[#allocation6 + $0x10] sm:$0xff]  ;;  %vm224_vm6 = vcmask 261120   ;;  %s1612_s23 = sshll.u32 %s2423_s9, 4  ;;  %s1613_s23 = int_to_ptr.hbm [resolvable:$true] %s1612_s23 }
  0x1e   :  { %189 = vmatpush.msra.mxu0 %v127_v1  ;;  %443 = vmatpush.msra.mxu1 %v2122_v3  ;;  %v2143_v8 = vld [vmem:[#allocation11] sm:$0xff]  ;;  %v137_v9 = vld [vmem:[#allocation6 + $0x18] sm:$0xff]  ;;  %v138_v10 = vld [vmem:[#allocation6 + $0x20] sm:$0xff] }
  0x1f   :  { %1629 = vmatmul.msk.f32.vlgmr.msra.gmra.mxu0 %vm145_vm1, %v134_v2  ;;  %308 = vmatpush.msra.mxu2 %v2124_v4  ;;  %v139_v11 = vld [vmem:[#allocation6 + $0x28] sm:$0xff]  ;;  %v140_v12 = vld [vmem:[#allocation6 + $0x30] sm:$0xff]  ;;  %v141_v13 = vld [vmem:[#allocation6 + $0x38] sm:$0xff] }
  0x20   :  { %240 = vmatpush.msrb.mxu0 %v2122_v3  ;;  %376 = vmatpush.msra.mxu3 %v2124_v4  ;;  %v1699_v16 = vld [vmem:[%s2417_s3] ss:$0 sm:$0xff]  ;;  %s2033_s3 = smov 32  }
  0x21   :  { %309 = vmatpush.msra.mxu2 %v2132_v5  ;;  %444 = vmatpush.msra.mxu1 %v2124_v4 }
  0x22   :  { %241 = vmatpush.msrb.mxu0 %v2124_v4  ;;  %377 = vmatpush.msra.mxu3 %v2132_v5 }
  0x23   :  { %445 = vmatpush.msra.mxu1 %v2132_v5  ;;  %310 = vmatpush.msra.mxu2 %v2143_v8 }
  0x24   :  { %242 = vmatpush.msrb.mxu0 %v2132_v5  ;;  %378 = vmatpush.msra.mxu3 %v2143_v8 }
  0x25   :  { %446 = vmatpush.msra.mxu1 %v2143_v8  ;;  %511 = vmatpush.msrb.mxu2 %v2122_v3 }
  0x26   :  { %243 = vmatpush.msrb.mxu0 %v2143_v8  ;;  %579 = vmatpush.msrb.mxu3 %v2122_v3 }
  0x27   :  { %1630 = vmatmul.msk.f32.gmra.mxu0 %vm145_vm1, %v135_v6  ;;  %647 = vmatpush.msrb.mxu1 %v2122_v3 }
  0x28   :  { %512 = vmatpush.msrb.mxu2 %v2124_v4  ;;  %580 = vmatpush.msrb.mxu3 %v2124_v4 }
  0x29   :  { %648 = vmatpush.msrb.mxu1 %v2124_v4 }
  0x2a   :  { %513 = vmatpush.msrb.mxu2 %v2132_v5  ;;  %581 = vmatpush.msrb.mxu3 %v2132_v5 }
  0x2b   :  { %649 = vmatpush.msrb.mxu1 %v2132_v5 }
  0x2c   :  { %514 = vmatpush.msrb.mxu2 %v2143_v8  ;;  %582 = vmatpush.msrb.mxu3 %v2143_v8 }
  0x2d   :  { %650 = vmatpush.msrb.mxu1 %v2143_v8 }
  0x2f   :  { %1631 = vmatmul.msk.f32.gmra.mxu0 %vm145_vm1, %v136_v7 }
  0x37   :  { %1632 = vmatmul.msk.f32.gmra.mxu0 %vm145_vm1, %v137_v9 }
  0x3f   :  { %1633 = vmatmul.msk.f32.gmra.mxu0 %vm145_vm1, %v138_v10 }
  0x47   :  { %1634 = vmatmul.msk.f32.gmra.mxu0 %vm145_vm1, %v139_v11 }
  0x4f   :  { %1635 = vmatmul.msk.f32.gmra.mxu0 %vm145_vm1, %v140_v12 }
  0x57   :  { %1636 = vmatmul.msk.f32.gmra.mxu0 %vm145_vm1, %v141_v13 }
  0x5f   :  { %244 = vmatmul.f32.vlgmr.msrb.gmra.mxu0 %v2032_v14 }
  0x9c   :  { %v191_v15 = vpop.f32.mrf.mxu0 }
  0x9d   :  { %v192_v31 = vadd.f32 %v1699_v16, %v191_v15 }
  0xa4   :  { %v194_v17 = vpop.f32.mrf.mxu0 }
  0xa5   :  { %v195_v18 = vadd.f32 %v1699_v16, %v194_v17 }
  0xac   :  { %v197_v19 = vpop.f32.mrf.mxu0 }
  0xad   :  { %v2170_v20 = vadd.f32 %v1699_v16, %v197_v19 }
  0xb4   :  { %v200_v21 = vpop.f32.mrf.mxu0 }
  0xb5   :  { %v2172_v22 = vadd.f32 %v1699_v16, %v200_v21 }
  0xbc   :  { %v203_v23 = vpop.f32.mrf.mxu0 }
  0xbd   :  { %v2174_v24 = vadd.f32 %v1699_v16, %v203_v23 }
  0xc4   :  { %v206_v25 = vpop.f32.mrf.mxu0 }
  0xc5   :  { %v2176_v26 = vadd.f32 %v1699_v16, %v206_v25 }
  0xcc   :  { %v209_v27 = vpop.f32.mrf.mxu0 }
  0xcd   :  { %v2178_v28 = vadd.f32 %v1699_v16, %v209_v27 }
  0xd4   :  { %v212_v29 = vpop.f32.mrf.mxu0 }
  0xd5   :  { %v2180_v30 = vadd.f32 %v1699_v16, %v212_v29 }
  0xdc   :  { %v245_v32 = vpop.f32.mrf.mxu0 }
  0xdd   :  { %v248_v33 = vadd.f32 %v245_v32, %v192_v31 }
  0xdf   :  { %1702 = vtanh.f32 %v248_v33  ;;  %v1637_v35 = vmul.f32 -1.442695, %v248_v33 }
  0xe1   :  { %1704 = vpow2.f32 %v1637_v35 }
  0xe5   :  { %v1703_v34 = vpop.eup %1702 }
  0xe6   :  { %271 = vrot.lane.b32.xlu0 %v1703_v34, %s2033_s3 }
  0xe7   :  { %v1705_v36 = vpop.eup %1704 }
  0xe8   :  { %v252_v37 = vadd.f32 1.0, %v1705_v36 }
  0xea   :  { %1706 = vrcp.f32 %v252_v37  ;;  %v264_v43 = vand.u32 2147483648, %v252_v37  ;;  %vm258_vm3 = vweird.f32 %v252_v37  ;;  %v262_v44 = vand.u32 2147483647, %v252_v37 }
  0xec   :  { %v265_v46 = vor.u32 1.1754944e-38, %v264_v43  ;;  %vm263_vm5 = vcmp.eq.f32.partialorder %v262_v44, 8.507059e+37 }
  0xf0   :  { %v1707_v38 = vpop.eup %1706 }
  0xf1   :  { %v254_v39 = vmul.f32 %v1707_v38, %v252_v37  ;;  %vm259_vm2 = vweird.f32 %v1707_v38 }
  0xf2   :  { %vm260_vm4 = vmor %vm258_vm3, %vm259_vm2 }
  0xf3   :  { %v255_v40 = vsub.f32 1.0, %v254_v39 }
  0xf5   :  { %v256_v41 = vmul.f32 %v1707_v38, %v255_v40 }
  0xf7   :  { %v257_v42 = vadd.f32 %v1707_v38, %v256_v41 }
  0xf9   :  { %v261_v45 = vsel %vm260_vm4, %v1707_v38, %v257_v42 }
  0xfa   :  { %v266_v48 = vsel %vm263_vm5, %v265_v46, %v261_v45 }
  0xfb   :  { %v269_v50 = vmul.f32 0.0, %v266_v48 }
 0x158   :  { %v272_v47 = vpop.permute.xlu0 %271 }
 0x159   :  { %v274_v49 = vmul.f32 %v272_v47, %v266_v48 }
 0x15b   :  { %276 = vrot.lane.b32.xlu0 %v274_v49, %s2033_s3 }
 0x1cd   :  { %v277_v51 = vpop.permute.xlu0 %276 }
 0x1ce   :  { %v279_v52 = vadd.f32 %v277_v51, %v269_v50 }
 0x1d0   :  { %1708 = vtanh.f32 %v279_v52 }
 0x1d6   :  { %v1709_v53 = vpop.eup %1708 }
 0x1d7   :  { %282 = vrot.lane.b32.xlu1 %v1709_v53, %s2033_s3 }
 0x249   :  { %v283_v54 = vpop.permute.xlu1 %282 }
 0x24a   :  { %v285_v55 = vmul.f32 %v283_v54, %v266_v48 }
 0x24c   :  { %287 = vrot.lane.b32.xlu1 %v285_v55, %s2034_s16 }
 0x2be   :  { %v288_v56 = vpop.permute.xlu1 %287 }
 0x2bf   :  { %290 = vst.msk [vmem:[#allocation3] sm:$0xff] %vm224_vm6, %v288_v56  ;;  %1638 = vmatmul.msk.f32.vlgmr.msra.gmra.mxu2 %vm224_vm6, %v288_v56 }
 0x2c0   :  { %715 = vmatpush.msra.mxu2 %v2122_v3 }
 0x2c2   :  { %716 = vmatpush.msra.mxu2 %v2124_v4 }
 0x2c4   :  { %717 = vmatpush.msra.mxu2 %v2132_v5 }
 0x2c6   :  { %718 = vmatpush.msra.mxu2 %v2143_v8 }
 0x342   :  { %v312_v57 = vpop.f32.mrf.mxu2 }
 0x343   :  { %v315_v58 = vadd.f32 %v312_v57, %v195_v18 }
 0x345   :  { %1710 = vtanh.f32 %v315_v58  ;;  %v1639_v60 = vmul.f32 -1.442695, %v315_v58 }
 0x347   :  { %1712 = vpow2.f32 %v1639_v60 }
 0x34b   :  { %v1711_v59 = vpop.eup %1710 }
 0x34c   :  { %338 = vrot.lane.b32.xlu2 %v1711_v59, %s2033_s3 }
 0x34d   :  { %v1713_v61 = vpop.eup %1712 }
 0x34e   :  { %v319_v62 = vadd.f32 1.0, %v1713_v61 }
 0x350   :  { %1714 = vrcp.f32 %v319_v62  ;;  %v331_v4 = vand.u32 2147483648, %v319_v62  ;;  %vm325_vm8 = vweird.f32 %v319_v62  ;;  %v329_v5 = vand.u32 2147483647, %v319_v62 }
 0x352   :  { %v332_v7 = vor.u32 1.1754944e-38, %v331_v4  ;;  %vm330_vm10 = vcmp.eq.f32.partialorder %v329_v5, 8.507059e+37 }
 0x356   :  { %v1715_v63 = vpop.eup %1714 }
 0x357   :  { %v321_v0 = vmul.f32 %v1715_v63, %v319_v62  ;;  %vm326_vm7 = vweird.f32 %v1715_v63 }
 0x358   :  { %vm327_vm9 = vmor %vm325_vm8, %vm326_vm7 }
 0x359   :  { %v322_v1 = vsub.f32 1.0, %v321_v0 }
 0x35b   :  { %v323_v2 = vmul.f32 %v1715_v63, %v322_v1 }
 0x35d   :  { %v324_v3 = vadd.f32 %v1715_v63, %v323_v2 }
 0x35f   :  { %v328_v6 = vsel %vm327_vm9, %v1715_v63, %v324_v3 }
 0x360   :  { %v333_v9 = vsel %vm330_vm10, %v332_v7, %v328_v6 }
 0x361   :  { %v336_v11 = vmul.f32 %v333_v9, %v279_v52 }
 0x3a6   :  { %v339_v8 = vpop.permute.xlu2 %338 }
 0x3a7   :  { %v341_v10 = vmul.f32 %v339_v8, %v333_v9 }
 0x3a9   :  { %343 = vrot.lane.b32.xlu2 %v341_v10, %s2033_s3 }
 0x403   :  { %v344_v12 = vpop.permute.xlu2 %343 }
 0x404   :  { %v346_v13 = vadd.f32 %v344_v12, %v336_v11 }
 0x406   :  { %1716 = vtanh.f32 %v346_v13 }
 0x40c   :  { %v1717_v15 = vpop.eup %1716 }
 0x40d   :  { %349 = vrot.lane.b32.xlu0 %v1717_v15, %s2033_s3 }
 0x47f   :  { %v350_v16 = vpop.permute.xlu0 %349 }
 0x480   :  { %v352_v17 = vmul.f32 %v350_v16, %v333_v9 }
 0x482   :  { %354 = vrot.lane.b32.xlu1 %v352_v17, %s2034_s16 }
 0x4f4   :  { %v355_v18 = vpop.permute.xlu1 %354 }
 0x4f5   :  { %358 = vst.msk [vmem:[#allocation3 + $0x8] sm:$0xff] %vm224_vm6, %v355_v18  ;;  %1640 = vmatmul.msk.f32.vlgmr.msra.gmra.mxu3 %vm224_vm6, %v355_v18 }
 0x578   :  { %v380_v19 = vpop.f32.mrf.mxu3 }
 0x579   :  { %v383_v21 = vadd.f32 %v380_v19, %v2170_v20 }
 0x57b   :  { %1718 = vtanh.f32 %v383_v21  ;;  %v1641_v25 = vmul.f32 -1.442695, %v383_v21 }
 0x57d   :  { %1720 = vpow2.f32 %v1641_v25 }
 0x581   :  { %v1719_v23 = vpop.eup %1718 }
 0x582   :  { %406 = vrot.lane.b32.xlu2 %v1719_v23, %s2033_s3 }
 0x583   :  { %v1721_v27 = vpop.eup %1720 }
 0x584   :  { %v387_v29 = vadd.f32 1.0, %v1721_v27 }
 0x586   :  { %1722 = vrcp.f32 %v387_v29  ;;  %v399_v36 = vand.u32 2147483648, %v387_v29  ;;  %vm393_vm12 = vweird.f32 %v387_v29  ;;  %v397_v37 = vand.u32 2147483647, %v387_v29 }
 0x588   :  { %v400_v38 = vor.u32 1.1754944e-38, %v399_v36  ;;  %vm398_vm14 = vcmp.eq.f32.partialorder %v397_v37, 8.507059e+37 }
 0x58c   :  { %v1723_v31 = vpop.eup %1722 }
 0x58d   :  { %v389_v32 = vmul.f32 %v1723_v31, %v387_v29  ;;  %vm394_vm11 = vweird.f32 %v1723_v31 }
 0x58e   :  { %vm395_vm13 = vmor %vm393_vm12, %vm394_vm11 }
 0x58f   :  { %v390_v33 = vsub.f32 1.0, %v389_v32 }
 0x591   :  { %v391_v34 = vmul.f32 %v1723_v31, %v390_v33 }
 0x593   :  { %v392_v35 = vadd.f32 %v1723_v31, %v391_v34 }
 0x595   :  { %v396_v20 = vsel %vm395_vm13, %v1723_v31, %v392_v35 }
 0x596   :  { %v401_v40 = vsel %vm398_vm14, %v400_v38, %v396_v20  ;;  %v774_v38 = vld [vmem:[#allocation15 + $0x18] sm:$0xff] }
 0x597   :  { %v404_v42 = vmul.f32 %v401_v40, %v346_v13  ;;  %799 = vmatpush.msra.mxu3 %v774_v38 }
 0x5dc   :  { %v407_v39 = vpop.permute.xlu2 %406 }
 0x5dd   :  { %v409_v41 = vmul.f32 %v407_v39, %v401_v40  ;;  %v773_v39 = vld [vmem:[#allocation15 + $0x10] sm:$0xff] }
 0x5de   :  { %800 = vmatpush.msra.mxu3 %v773_v39 }
 0x5df   :  { %411 = vrot.lane.b32.xlu0 %v409_v41, %s2033_s3  ;;  %v771_v41 = vld [vmem:[#allocation15] sm:$0xff] }
 0x651   :  { %v412_v43 = vpop.permute.xlu0 %411 }
 0x652   :  { %v414_v44 = vadd.f32 %v412_v43, %v404_v42 }
 0x654   :  { %1724 = vtanh.f32 %v414_v44 }
 0x65a   :  { %v1725_v45 = vpop.eup %1724 }
 0x65b   :  { %417 = vrot.lane.b32.xlu1 %v1725_v45, %s2033_s3 }
 0x6cd   :  { %v418_v46 = vpop.permute.xlu1 %417 }
 0x6ce   :  { %v420_v47 = vmul.f32 %v418_v46, %v401_v40  ;;  %v772_v40 = vld [vmem:[#allocation15 + $0x8] sm:$0xff] }
 0x6cf   :  { %801 = vmatpush.msra.mxu3 %v772_v40  ;;  %v2242_v40 = vld [vmem:[#allocation14 + $0x18] sm:$0xff] }
 0x6d0   :  { %422 = vrot.lane.b32.xlu2 %v420_v47, %s2034_s16  ;;  %1394 = vmatpush.msra.mxu0 %v2242_v40 }
 0x6d1   :  { %802 = vmatpush.msra.mxu3 %v771_v41  ;;  %v2244_v41 = vld [vmem:[#allocation14 + $0x10] sm:$0xff] }
 0x6d2   :  { %1395 = vmatpush.msra.mxu0 %v2244_v41 }
 0x72a   :  { %v423_v48 = vpop.permute.xlu2 %422 }
 0x72b   :  { %426 = vst.msk [vmem:[#allocation3 + $0x10] sm:$0xff] %vm224_vm6, %v423_v48  ;;  %1642 = vmatmul.msk.f32.vlgmr.msra.gmra.mxu1 %vm224_vm6, %v423_v48 }
 0x7a8   :  { %v448_v49 = vpop.f32.mrf.mxu1 }
 0x7a9   :  { %v451_v50 = vadd.f32 %v448_v49, %v2172_v22 }
 0x7ab   :  { %1726 = vtanh.f32 %v451_v50  ;;  %v1643_v52 = vmul.f32 -1.442695, %v451_v50 }
 0x7ad   :  { %1728 = vpow2.f32 %v1643_v52 }
 0x7b1   :  { %v1727_v51 = vpop.eup %1726 }
 0x7b2   :  { %474 = vrot.lane.b32.xlu0 %v1727_v51, %s2033_s3 }
 0x7b3   :  { %v1729_v53 = vpop.eup %1728 }
 0x7b4   :  { %v455_v54 = vadd.f32 1.0, %v1729_v53 }
 0x7b6   :  { %1730 = vrcp.f32 %v455_v54  ;;  %v467_v60 = vand.u32 2147483648, %v455_v54  ;;  %vm461_vm0 = vweird.f32 %v455_v54  ;;  %v465_v61 = vand.u32 2147483647, %v455_v54 }
 0x7b8   :  { %v468_v62 = vor.u32 1.1754944e-38, %v467_v60  ;;  %vm466_vm2 = vcmp.eq.f32.partialorder %v465_v61, 8.507059e+37 }
 0x7bc   :  { %v1731_v55 = vpop.eup %1730 }
 0x7bd   :  { %v457_v56 = vmul.f32 %v1731_v55, %v455_v54  ;;  %vm462_vm15 = vweird.f32 %v1731_v55 }
 0x7be   :  { %vm463_vm1 = vmor %vm461_vm0, %vm462_vm15 }
 0x7bf   :  { %v458_v57 = vsub.f32 1.0, %v457_v56 }
 0x7c1   :  { %v459_v58 = vmul.f32 %v1731_v55, %v458_v57 }
 0x7c3   :  { %v460_v59 = vadd.f32 %v1731_v55, %v459_v58 }
 0x7c5   :  { %v464_v22 = vsel %vm463_vm1, %v1731_v55, %v460_v59 }
 0x7c6   :  { %v469_v0 = vsel %vm466_vm2, %v468_v62, %v464_v22 }
 0x7c7   :  { %v472_v2 = vmul.f32 %v469_v0, %v414_v44 }
 0x824   :  { %v475_v63 = vpop.permute.xlu0 %474 }
 0x825   :  { %v477_v1 = vmul.f32 %v475_v63, %v469_v0 }
 0x827   :  { %479 = vrot.lane.b32.xlu1 %v477_v1, %s2033_s3 }
 0x899   :  { %v480_v3 = vpop.permute.xlu1 %479 }
 0x89a   :  { %v482_v4 = vadd.f32 %v480_v3, %v472_v2  ;;  %v823_v2 = vld [vmem:[#allocation12 + $0x18] sm:$0xff]  ;;  %v822_v3 = vld [vmem:[#allocation12 + $0x10] sm:$0xff] }
 0x89b   :  { %876 = vmatpush.msra.mxu1 %v823_v2 }
 0x89c   :  { %1732 = vtanh.f32 %v482_v4 }
 0x89d   :  { %877 = vmatpush.msra.mxu1 %v822_v3 }
 0x8a2   :  { %v1733_v5 = vpop.eup %1732 }
 0x8a3   :  { %485 = vrot.lane.b32.xlu2 %v1733_v5, %s2033_s3  ;;  %v820_v5 = vld [vmem:[#allocation12] sm:$0xff] }
 0x8fd   :  { %v486_v6 = vpop.permute.xlu2 %485 }
 0x8fe   :  { %v488_v7 = vmul.f32 %v486_v6, %v469_v0 }
 0x900   :  { %490 = vrot.lane.b32.xlu0 %v488_v7, %s2034_s16 }
 0x972   :  { %v491_v8 = vpop.permute.xlu0 %490 }
 0x973   :  { %494 = vst.msk [vmem:[#allocation3 + $0x18] sm:$0xff] %vm224_vm6, %v491_v8  ;;  %1644 = vmatmul.msk.f32.vlgmr.msrb.gmra.mxu2 %vm224_vm6, %v491_v8  ;;  %v829_v8 = vld [vmem:[#allocation3] sm:$0xff] }
 0x974   :  { %926 = vmatpush.msrb.mxu2 %v2242_v40 }
 0x976   :  { %927 = vmatpush.msrb.mxu2 %v2244_v41 }
 0x9f6   :  { %v516_v9 = vpop.f32.mrf.mxu2 }
 0x9f7   :  { %v519_v10 = vadd.f32 %v516_v9, %v2174_v24  ;;  %v830_v9 = vld [vmem:[#allocation3 + $0x8] sm:$0xff] }
 0x9f9   :  { %1734 = vtanh.f32 %v519_v10  ;;  %v1645_v12 = vmul.f32 -1.442695, %v519_v10  ;;  %v831_v10 = vld [vmem:[#allocation3 + $0x10] sm:$0xff] }
 0x9fb   :  { %1736 = vpow2.f32 %v1645_v12 }
 0x9ff   :  { %v1735_v11 = vpop.eup %1734 }
 0xa00   :  { %542 = vrot.lane.b32.xlu1 %v1735_v11, %s2033_s3  ;;  %v832_v11 = vld [vmem:[#allocation3 + $0x18] sm:$0xff] }
 0xa01   :  { %v1737_v13 = vpop.eup %1736 }
 0xa02   :  { %v523_v15 = vadd.f32 1.0, %v1737_v13 }
 0xa04   :  { %1738 = vrcp.f32 %v523_v15  ;;  %v535_v23 = vand.u32 2147483648, %v523_v15  ;;  %vm529_vm4 = vweird.f32 %v523_v15  ;;  %v533_v25 = vand.u32 2147483647, %v523_v15 }
 0xa06   :  { %v536_v27 = vor.u32 1.1754944e-38, %v535_v23  ;;  %vm534_vm7 = vcmp.eq.f32.partialorder %v533_v25, 8.507059e+37 }
 0xa0a   :  { %v1739_v16 = vpop.eup %1738 }
 0xa0b   :  { %v525_v17 = vmul.f32 %v1739_v16, %v523_v15  ;;  %vm530_vm3 = vweird.f32 %v1739_v16 }
 0xa0c   :  { %vm531_vm5 = vmor %vm529_vm4, %vm530_vm3 }
 0xa0d   :  { %v526_v18 = vsub.f32 1.0, %v525_v17 }
 0xa0f   :  { %v527_v19 = vmul.f32 %v1739_v16, %v526_v18 }
 0xa11   :  { %v528_v21 = vadd.f32 %v1739_v16, %v527_v19 }
 0xa13   :  { %v532_v24 = vsel %vm531_vm5, %v1739_v16, %v528_v21 }
 0xa14   :  { %v537_v31 = vsel %vm534_vm7, %v536_v27, %v532_v24 }
 0xa15   :  { %v540_v33 = vmul.f32 %v537_v31, %v482_v4  ;;  %v821_v4 = vld [vmem:[#allocation12 + $0x8] sm:$0xff] }
 0xa16   :  { %878 = vmatpush.msra.mxu1 %v821_v4 }
 0xa18   :  { %879 = vmatpush.msra.mxu1 %v820_v5 }
 0xa72   :  { %v543_v29 = vpop.permute.xlu1 %542 }
 0xa73   :  { %v545_v32 = vmul.f32 %v543_v29, %v537_v31 }
 0xa75   :  { %547 = vrot.lane.b32.xlu2 %v545_v32, %s2033_s3 }
 0xacf   :  { %v548_v34 = vpop.permute.xlu2 %547 }
 0xad0   :  { %v550_v35 = vadd.f32 %v548_v34, %v540_v33 }
 0xad2   :  { %1740 = vtanh.f32 %v550_v35 }
 0xad8   :  { %v1741_v36 = vpop.eup %1740 }
 0xad9   :  { %553 = vrot.lane.b32.xlu0 %v1741_v36, %s2033_s3 }
 0xb4b   :  { %v554_v37 = vpop.permute.xlu0 %553 }
 0xb4c   :  { %v556_v20 = vmul.f32 %v554_v37, %v537_v31 }
 0xb4e   :  { %558 = vrot.lane.b32.xlu1 %v556_v20, %s2034_s16 }
 0xbc0   :  { %v559_v42 = vpop.permute.xlu1 %558 }
 0xbc1   :  { %562 = vst.msk [vmem:[#allocation3 + $0x20] sm:$0xff] %vm224_vm6, %v559_v42  ;;  %1646 = vmatmul.msk.f32.vlgmr.msrb.gmra.mxu3 %vm224_vm6, %v559_v42  ;;  %v2248_v42 = vld [vmem:[#allocation14 + $0x8] sm:$0xff] }
 0xbc2   :  { %1193 = vmatpush.msrb.mxu3 %v2242_v40  ;;  %928 = vmatpush.msrb.mxu2 %v2248_v42 }
 0xbc3   :  { %1396 = vmatpush.msra.mxu0 %v2248_v42 }
 0xbc4   :  { %1194 = vmatpush.msrb.mxu3 %v2244_v41 }
 0xbc6   :  { %1195 = vmatpush.msrb.mxu3 %v2248_v42 }
 0xbc8   :  { %v767_v43 = vld [vmem:[#allocation3 + $0x20] sm:$0xff] }
 0xbc9   :  { %1652 = vmatmul.msk.f32.vlgmr.msra.gmra.mxu3 %vm224_vm6, %v767_v43 }
 0xc44   :  { %v584_v44 = vpop.f32.mrf.mxu3 }
 0xc45   :  { %v587_v45 = vadd.f32 %v584_v44, %v2176_v26 }
 0xc47   :  { %1742 = vtanh.f32 %v587_v45  ;;  %v1647_v47 = vmul.f32 -1.442695, %v587_v45 }
 0xc49   :  { %1744 = vpow2.f32 %v1647_v47 }
 0xc4d   :  { %v1743_v46 = vpop.eup %1742 }
 0xc4e   :  { %610 = vrot.lane.b32.xlu2 %v1743_v46, %s2033_s3 }
 0xc4f   :  { %v1745_v48 = vpop.eup %1744 }
 0xc50   :  { %v591_v49 = vadd.f32 1.0, %v1745_v48  ;;  %v2285_v48 = vld [vmem:[%s2420_s6] ss:$0 sm:$0xff] }
 0xc52   :  { %1746 = vrcp.f32 %v591_v49  ;;  %v603_v55 = vand.u32 2147483648, %v591_v49  ;;  %vm597_vm9 = vweird.f32 %v591_v49  ;;  %v601_v56 = vand.u32 2147483647, %v591_v49 }
 0xc54   :  { %v604_v57 = vor.u32 1.1754944e-38, %v603_v55  ;;  %vm602_vm11 = vcmp.eq.f32.partialorder %v601_v56, 8.507059e+37 }
 0xc58   :  { %v1747_v50 = vpop.eup %1746 }
 0xc59   :  { %v593_v51 = vmul.f32 %v1747_v50, %v591_v49  ;;  %vm598_vm8 = vweird.f32 %v1747_v50 }
 0xc5a   :  { %vm599_vm10 = vmor %vm597_vm9, %vm598_vm8 }
 0xc5b   :  { %v594_v52 = vsub.f32 1.0, %v593_v51 }
 0xc5d   :  { %v595_v53 = vmul.f32 %v1747_v50, %v594_v52 }
 0xc5f   :  { %v596_v54 = vadd.f32 %v1747_v50, %v595_v53 }
 0xc61   :  { %v600_v26 = vsel %vm599_vm10, %v1747_v50, %v596_v54 }
 0xc62   :  { %v605_v59 = vsel %vm602_vm11, %v604_v57, %v600_v26 }
 0xc63   :  { %v608_v61 = vmul.f32 %v605_v59, %v550_v35 }
 0xca8   :  { %v611_v58 = vpop.permute.xlu2 %610 }
 0xca9   :  { %v613_v60 = vmul.f32 %v611_v58, %v605_v59 }
 0xcab   :  { %615 = vrot.lane.b32.xlu0 %v613_v60, %s2033_s3 }
 0xd1d   :  { %v616_v22 = vpop.permute.xlu0 %615 }
 0xd1e   :  { %v618_v62 = vadd.f32 %v616_v22, %v608_v61 }
 0xd20   :  { %1748 = vtanh.f32 %v618_v62 }
 0xd26   :  { %v1749_v63 = vpop.eup %1748 }
 0xd27   :  { %621 = vrot.lane.b32.xlu1 %v1749_v63, %s2033_s3 }
 0xd99   :  { %v622_v0 = vpop.permute.xlu1 %621 }
 0xd9a   :  { %v624_v1 = vmul.f32 %v622_v0, %v605_v59 }
 0xd9c   :  { %626 = vrot.lane.b32.xlu2 %v624_v1, %s2034_s16 }
 0xdf6   :  { %v627_v6 = vpop.permute.xlu2 %626 }
 0xdf7   :  { %630 = vst.msk [vmem:[#allocation3 + $0x28] sm:$0xff] %vm224_vm6, %v627_v6  ;;  %1648 = vmatmul.msk.f32.vlgmr.msrb.gmra.mxu1 %vm224_vm6, %v627_v6 }
 0xdfe   :  { %v768_v7 = vld [vmem:[#allocation3 + $0x28] sm:$0xff] }
 0xdff   :  { %1653 = vmatmul.msk.f32.gmra.mxu3 %vm224_vm6, %v768_v7  ;;  %1656 = vmatmul.msk.f32.vlgmr.msra.gmra.mxu1 %vm224_vm6, %v829_v8 }
 0xe07   :  { %1657 = vmatmul.msk.f32.gmra.mxu1 %vm224_vm6, %v830_v9 }
 0xe0f   :  { %1658 = vmatmul.msk.f32.gmra.mxu1 %vm224_vm6, %v831_v10 }
 0xe17   :  { %1659 = vmatmul.msk.f32.gmra.mxu1 %vm224_vm6, %v832_v11 }
 0xe1f   :  { %1660 = vmatmul.msk.f32.gmra.mxu1 %vm224_vm6, %v767_v43  ;;  %v2253_v43 = vld [vmem:[#allocation14] sm:$0xff] }
 0xe20   :  { %929 = vmatpush.msrb.mxu2 %v2253_v43  ;;  %1196 = vmatpush.msrb.mxu3 %v2253_v43 }
 0xe21   :  { %1397 = vmatpush.msra.mxu0 %v2253_v43 }
 0xe22   :  { %1327 = vmatpush.msra.mxu3 %v2242_v40 }
 0xe24   :  { %1328 = vmatpush.msra.mxu3 %v2244_v41 }
 0xe26   :  { %1329 = vmatpush.msra.mxu3 %v2248_v42 }
 0xe27   :  { %1661 = vmatmul.msk.f32.gmra.mxu1 %vm224_vm6, %v768_v7 }
 0xe28   :  { %1330 = vmatpush.msra.mxu3 %v2253_v43 }
 0xe74   :  { %v652_v12 = vpop.f32.mrf.mxu1 }
 0xe75   :  { %v655_v13 = vadd.f32 %v652_v12, %v2178_v28 }
 0xe77   :  { %1750 = vtanh.f32 %v655_v13  ;;  %v1649_v16 = vmul.f32 -1.442695, %v655_v13 }
 0xe79   :  { %1752 = vpow2.f32 %v1649_v16 }
 0xe7c   :  { %v881_v49 = vpop.f32.mrf.mxu1 }
 0xe7d   :  { %v1751_v15 = vpop.eup %1750 }
 0xe7e   :  { %678 = vrot.lane.b32.xlu0 %v1751_v15, %s2033_s3 }
 0xe7f   :  { %v1753_v17 = vpop.eup %1752 }
 0xe80   :  { %v659_v18 = vadd.f32 1.0, %v1753_v17 }
 0xe82   :  { %1754 = vrcp.f32 %v659_v18  ;;  %v671_v27 = vand.u32 2147483648, %v659_v18  ;;  %vm665_vm13 = vweird.f32 %v659_v18  ;;  %v669_v29 = vand.u32 2147483647, %v659_v18 }
 0xe84   :  { %v672_v31 = vor.u32 1.1754944e-38, %v671_v27  ;;  %vm670_vm15 = vcmp.eq.f32.partialorder %v669_v29, 8.507059e+37  ;;  %v884_v8 = vpop.f32.mrf.mxu1 }
 0xe85   :  { %v885_v9 = vadd.f32 %v2285_v48, %v884_v8 }
 0xe88   :  { %v1755_v19 = vpop.eup %1754 }
 0xe89   :  { %v661_v21 = vmul.f32 %v1755_v19, %v659_v18  ;;  %vm666_vm12 = vweird.f32 %v1755_v19 }
 0xe8a   :  { %vm667_vm14 = vmor %vm665_vm13, %vm666_vm12 }
 0xe8b   :  { %v662_v23 = vsub.f32 1.0, %v661_v21 }
 0xe8d   :  { %v663_v25 = vmul.f32 %v1755_v19, %v662_v23 }
 0xe8f   :  { %v664_v24 = vadd.f32 %v1755_v19, %v663_v25 }
 0xe91   :  { %v668_v28 = vsel %vm667_vm14, %v1755_v19, %v664_v24 }
 0xe92   :  { %v673_v33 = vsel %vm670_vm15, %v672_v31, %v668_v28 }
 0xe93   :  { %v676_v35 = vmul.f32 %v673_v33, %v618_v62 }
 0xef0   :  { %v679_v32 = vpop.permute.xlu0 %678 }
 0xef1   :  { %v681_v34 = vmul.f32 %v679_v32, %v673_v33 }
 0xef3   :  { %683 = vrot.lane.b32.xlu1 %v681_v34, %s2033_s3 }
 0xf65   :  { %v684_v36 = vpop.permute.xlu1 %683 }
 0xf66   :  { %v2237_v37 = vadd.f32 %v684_v36, %v676_v35 }
 0xf68   :  { %1756 = vtanh.f32 %v2237_v37 }
 0xf6e   :  { %v1757_v20 = vpop.eup %1756 }
 0xf6f   :  { %689 = vrot.lane.b32.xlu2 %v1757_v20, %s2033_s3 }
 0xfc9   :  { %v690_v38 = vpop.permute.xlu2 %689 }
 0xfca   :  { %v692_v39 = vmul.f32 %v690_v38, %v673_v33 }
 0xfcc   :  { %694 = vrot.lane.b32.xlu0 %v692_v39, %s2034_s16 }
0x103e   :  { %v695_v44 = vpop.permute.xlu0 %694 }
0x103f   :  { %698 = vst.msk [vmem:[#allocation3 + $0x30] sm:$0xff] %vm224_vm6, %v695_v44  ;;  %1650 = vmatmul.msk.f32.vlgmr.msra.gmra.mxu2 %vm224_vm6, %v695_v44  ;;  %v887_v44 = vpop.f32.mrf.mxu1 }
0x1040   :  { %992 = vmatpush.msra.mxu2 %v2242_v40 }
0x1042   :  { %993 = vmatpush.msra.mxu2 %v2244_v41 }
0x1044   :  { %994 = vmatpush.msra.mxu2 %v2248_v42 }
0x1046   :  { %v769_v45 = vld [vmem:[#allocation3 + $0x30] sm:$0xff]  ;;  %995 = vmatpush.msra.mxu2 %v2253_v43 }
0x1047   :  { %1654 = vmatmul.msk.f32.gmra.mxu3 %vm224_vm6, %v769_v45  ;;  %1662 = vmatmul.msk.f32.gmra.mxu1 %vm224_vm6, %v769_v45  ;;  %v888_v45 = vadd.f32 %v2285_v48, %v887_v44 }
0x1048   :  { %930 = vmatmul.f32.vlgmr.msrb.gmra.mxu2 %v2032_v14  ;;  %v882_v14 = vadd.f32 %v2285_v48, %v881_v49 }
0x1049   :  { %1059 = vmatpush.msrb.mxu2 %v2242_v40 }
0x104b   :  { %1060 = vmatpush.msrb.mxu2 %v2244_v41 }
0x104d   :  { %1061 = vmatpush.msrb.mxu2 %v2248_v42 }
0x104f   :  { %1062 = vmatpush.msrb.mxu2 %v2253_v43 }
0x10c2   :  { %v720_v46 = vpop.f32.mrf.mxu2 }
0x10c3   :  { %v2280_v47 = vadd.f32 %v720_v46, %v2180_v30 }
0x10cb   :  { %v931_v50 = vpop.f32.mrf.mxu2 }
0x10cc   :  { %v934_v51 = vadd.f32 %v931_v50, %v882_v14 }
0x10ce   :  { %1758 = vtanh.f32 %v934_v51  ;;  %v1664_v53 = vmul.f32 -1.442695, %v934_v51 }
0x10d0   :  { %1760 = vpow2.f32 %v1664_v53 }
0x10d4   :  { %v1759_v52 = vpop.eup %1758 }
0x10d5   :  { %957 = vrot.lane.b32.xlu1 %v1759_v52, %s2033_s3 }
0x10d6   :  { %v1761_v54 = vpop.eup %1760 }
0x10d7   :  { %v938_v55 = vadd.f32 1.0, %v1761_v54 }
0x10d9   :  { %1762 = vrcp.f32 %v938_v55  ;;  %v950_v59 = vand.u32 2147483648, %v938_v55  ;;  %vm944_vm1 = vweird.f32 %v938_v55  ;;  %v948_v60 = vand.u32 2147483647, %v938_v55 }
0x10db   :  { %v951_v22 = vor.u32 1.1754944e-38, %v950_v59  ;;  %vm949_vm3 = vcmp.eq.f32.partialorder %v948_v60, 8.507059e+37 }
0x10df   :  { %v1763_v30 = vpop.eup %1762 }
0x10e0   :  { %v940_v56 = vmul.f32 %v1763_v30, %v938_v55  ;;  %vm945_vm0 = vweird.f32 %v1763_v30 }
0x10e1   :  { %vm946_vm2 = vmor %vm944_vm1, %vm945_vm0 }
0x10e2   :  { %v941_v26 = vsub.f32 1.0, %v940_v56 }
0x10e4   :  { %v942_v57 = vmul.f32 %v1763_v30, %v941_v26 }
0x10e6   :  { %v943_v58 = vadd.f32 %v1763_v30, %v942_v57 }
0x10e8   :  { %v947_v61 = vsel %vm946_vm2, %v1763_v30, %v943_v58 }
0x10e9   :  { %v952_v63 = vsel %vm949_vm3, %v951_v22, %v947_v61 }
0x10ea   :  { %v955_v1 = vmul.f32 0.0, %v952_v63 }
0x1147   :  { %v958_v62 = vpop.permute.xlu1 %957 }
0x1148   :  { %v960_v0 = vmul.f32 %v958_v62, %v952_v63 }
0x114a   :  { %962 = vrot.lane.b32.xlu2 %v960_v0, %s2033_s3 }
0x11a4   :  { %v963_v2 = vpop.permute.xlu2 %962 }
0x11a5   :  { %v965_v3 = vadd.f32 %v963_v2, %v955_v1 }
0x11a7   :  { %1764 = vtanh.f32 %v965_v3 }
0x11ad   :  { %v1765_v4 = vpop.eup %1764 }
0x11ae   :  { %968 = vrot.lane.b32.xlu0 %v1765_v4, %s2033_s3 }
0x1220   :  { %v969_v5 = vpop.permute.xlu0 %968 }
0x1221   :  { %v971_v6 = vmul.f32 %v969_v5, %v952_v63  ;;  %v1651_v63 = vmul.f32 -1.442695, %v2280_v47 }
0x1223   :  { %973 = vrot.lane.b32.xlu1 %v971_v6, %s2034_s16 }
0x1295   :  { %v974_v7 = vpop.permute.xlu1 %973 }
0x1296   :  { %1665 = vmatmul.msk.f32.vlgmr.msra.gmra.mxu2 %vm224_vm6, %v974_v7 }
0x1297   :  { %1126 = vmatpush.msra.mxu2 %v2242_v40 }
0x1299   :  { %1127 = vmatpush.msra.mxu2 %v2244_v41 }
0x129b   :  { %1128 = vmatpush.msra.mxu2 %v2248_v42 }
0x129d   :  { %1129 = vmatpush.msra.mxu2 %v2253_v43 }
0x1319   :  { %v997_v10 = vpop.f32.mrf.mxu2 }
0x131a   :  { %v1000_v11 = vadd.f32 %v997_v10, %v885_v9 }
0x131c   :  { %1766 = vtanh.f32 %v1000_v11  ;;  %v1666_v13 = vmul.f32 -1.442695, %v1000_v11 }
0x131e   :  { %1768 = vpow2.f32 %v1666_v13 }
0x1322   :  { %v1767_v12 = vpop.eup %1766 }
0x1323   :  { %1023 = vrot.lane.b32.xlu2 %v1767_v12, %s2033_s3 }
0x1324   :  { %v1769_v15 = vpop.eup %1768 }
0x1325   :  { %v1004_v16 = vadd.f32 1.0, %v1769_v15 }
0x1327   :  { %1770 = vrcp.f32 %v1004_v16  ;;  %v1016_v25 = vand.u32 2147483648, %v1004_v16  ;;  %vm1010_vm5 = vweird.f32 %v1004_v16  ;;  %v1014_v24 = vand.u32 2147483647, %v1004_v16 }
0x1329   :  { %v1017_v29 = vor.u32 1.1754944e-38, %v1016_v25  ;;  %vm1015_vm8 = vcmp.eq.f32.partialorder %v1014_v24, 8.507059e+37 }
0x132d   :  { %v1771_v17 = vpop.eup %1770 }
0x132e   :  { %v1006_v18 = vmul.f32 %v1771_v17, %v1004_v16  ;;  %vm1011_vm4 = vweird.f32 %v1771_v17 }
0x132f   :  { %vm1012_vm7 = vmor %vm1010_vm5, %vm1011_vm4 }
0x1330   :  { %v1007_v19 = vsub.f32 1.0, %v1006_v18 }
0x1332   :  { %v1008_v21 = vmul.f32 %v1771_v17, %v1007_v19 }
0x1334   :  { %v1009_v23 = vadd.f32 %v1771_v17, %v1008_v21 }
0x1336   :  { %v1013_v27 = vsel %vm1012_vm7, %v1771_v17, %v1009_v23  ;;  %v890_v17 = vpop.f32.mrf.mxu1 }
0x1337   :  { %v1018_v31 = vsel %vm1015_vm8, %v1017_v29, %v1013_v27  ;;  %v891_v18 = vadd.f32 %v2285_v48, %v890_v17 }
0x1338   :  { %v1021_v33 = vmul.f32 %v1018_v31, %v965_v3 }
0x137d   :  { %v1024_v28 = vpop.permute.xlu2 %1023 }
0x137e   :  { %v1026_v32 = vmul.f32 %v1024_v28, %v1018_v31 }
0x1380   :  { %1028 = vrot.lane.b32.xlu0 %v1026_v32, %s2033_s3 }
0x13f2   :  { %v1029_v34 = vpop.permute.xlu0 %1028 }
0x13f3   :  { %v1031_v35 = vadd.f32 %v1029_v34, %v1021_v33 }
0x13f5   :  { %1772 = vtanh.f32 %v1031_v35 }
0x13fb   :  { %v1773_v36 = vpop.eup %1772 }
0x13fc   :  { %1034 = vrot.lane.b32.xlu1 %v1773_v36, %s2033_s3 }
0x146e   :  { %v1035_v20 = vpop.permute.xlu1 %1034 }
0x146f   :  { %v1037_v38 = vmul.f32 %v1035_v20, %v1018_v31 }
0x1471   :  { %1039 = vrot.lane.b32.xlu2 %v1037_v38, %s2034_s16 }
0x14cb   :  { %v1040_v39 = vpop.permute.xlu2 %1039 }
0x14cc   :  { %1667 = vmatmul.msk.f32.vlgmr.msrb.gmra.mxu2 %vm224_vm6, %v1040_v39 }
0x14cd   :  { %1260 = vmatpush.msrb.mxu2 %v2242_v40 }
0x14cf   :  { %1261 = vmatpush.msrb.mxu2 %v2244_v41 }
0x14d1   :  { %1262 = vmatpush.msrb.mxu2 %v2248_v42 }
0x14d3   :  { %1263 = vmatpush.msrb.mxu2 %v2253_v43 }
0x154f   :  { %v1064_v46 = vpop.f32.mrf.mxu2 }
0x1550   :  { %v1067_v49 = vadd.f32 %v1064_v46, %v888_v45 }
0x1552   :  { %1774 = vtanh.f32 %v1067_v49  ;;  %v1668_v50 = vmul.f32 -1.442695, %v1067_v49 }
0x1554   :  { %1776 = vpow2.f32 %v1668_v50 }
0x1558   :  { %v1775_v14 = vpop.eup %1774 }
0x1559   :  { %1090 = vrot.lane.b32.xlu0 %v1775_v14, %s2033_s3 }
0x155a   :  { %v1777_v51 = vpop.eup %1776 }
0x155b   :  { %v1071_v52 = vadd.f32 1.0, %v1777_v51 }
0x155d   :  { %1778 = vrcp.f32 %v1071_v52  ;;  %v1083_v43 = vand.u32 2147483648, %v1071_v52  ;;  %vm1077_vm10 = vweird.f32 %v1071_v52  ;;  %v1081_v55 = vand.u32 2147483647, %v1071_v52 }
0x155e   :  { %1780 = vtanh.f32 %v2280_v47 }
0x155f   :  { %v1084_v56 = vor.u32 1.1754944e-38, %v1083_v43  ;;  %vm1082_vm12 = vcmp.eq.f32.partialorder %v1081_v55, 8.507059e+37 }
0x1563   :  { %v1779_v40 = vpop.eup %1778 }
0x1564   :  { %v1073_v41 = vmul.f32 %v1779_v40, %v1071_v52  ;;  %vm1078_vm9 = vweird.f32 %v1779_v40  ;;  %v1781_v59 = vpop.eup %1780 }
0x1565   :  { %vm1079_vm11 = vmor %vm1077_vm10, %vm1078_vm9 }
0x1566   :  { %v1074_v53 = vsub.f32 1.0, %v1073_v41 }
0x1568   :  { %v1075_v42 = vmul.f32 %v1779_v40, %v1074_v53 }
0x156a   :  { %v1076_v54 = vadd.f32 %v1779_v40, %v1075_v42 }
0x156c   :  { %v1080_v30 = vsel %vm1079_vm11, %v1779_v40, %v1076_v54 }
0x156d   :  { %v1085_v57 = vsel %vm1082_vm12, %v1084_v56, %v1080_v30  ;;  %v2333_v30 = vpop.f32.mrf.mxu3 }
0x156e   :  { %v1088_v60 = vmul.f32 %v1085_v57, %v1031_v35 }
0x1575   :  { %v2335_v56 = vpop.f32.mrf.mxu3 }
0x15cb   :  { %v1091_v26 = vpop.permute.xlu0 %1090 }
0x15cc   :  { %v1093_v58 = vmul.f32 %v1091_v26, %v1085_v57  ;;  %v2337_v26 = vpop.f32.mrf.mxu3 }
0x15ce   :  { %1095 = vrot.lane.b32.xlu1 %v1093_v58, %s2033_s3  ;;  %v893_v58 = vpop.f32.mrf.mxu1 }
0x15d6   :  { %746 = vrot.lane.b32.xlu1 %v1781_v59, %s2033_s3  ;;  %v894_v59 = vadd.f32 %v2285_v48, %v893_v58 }
0x1640   :  { %v1096_v61 = vpop.permute.xlu1 %1095 }
0x1641   :  { %v2312_v22 = vadd.f32 %v1096_v61, %v1088_v60 }
0x1643   :  { %1782 = vtanh.f32 %v2312_v22 }
0x1644   :  { %1784 = vpow2.f32 %v1651_v63 }
0x1648   :  { %v747_v12 = vpop.permute.xlu1 %746 }
0x1649   :  { %v1783_v62 = vpop.eup %1782 }
0x164a   :  { %1101 = vrot.lane.b32.xlu2 %v1783_v62, %s2033_s3  ;;  %v1785_v0 = vpop.eup %1784 }
0x164b   :  { %v727_v1 = vadd.f32 1.0, %v1785_v0 }
0x164d   :  { %1786 = vrcp.f32 %v727_v1  ;;  %v739_v9 = vand.u32 2147483648, %v727_v1  ;;  %vm733_vm14 = vweird.f32 %v727_v1  ;;  %v737_v10 = vand.u32 2147483647, %v727_v1 }
0x164f   :  { %v740_v47 = vor.u32 1.1754944e-38, %v739_v9  ;;  %vm738_vm0 = vcmp.eq.f32.partialorder %v737_v10, 8.507059e+37 }
0x1653   :  { %v1787_v2 = vpop.eup %1786 }
0x1654   :  { %v729_v3 = vmul.f32 %v1787_v2, %v727_v1  ;;  %vm734_vm13 = vweird.f32 %v1787_v2 }
0x1655   :  { %vm735_vm15 = vmor %vm733_vm14, %vm734_vm13 }
0x1656   :  { %v730_v4 = vsub.f32 1.0, %v729_v3 }
0x1658   :  { %v731_v5 = vmul.f32 %v1787_v2, %v730_v4 }
0x165a   :  { %v732_v7 = vadd.f32 %v1787_v2, %v731_v5 }
0x165c   :  { %v736_v11 = vsel %vm735_vm15, %v1787_v2, %v732_v7 }
0x165d   :  { %v741_v13 = vsel %vm738_vm0, %v740_v47, %v736_v11 }
0x165e   :  { %v749_v15 = vmul.f32 %v747_v12, %v741_v13  ;;  %v744_v25 = vmul.f32 %v741_v13, %v2237_v37 }
0x16a4   :  { %v1102_v6 = vpop.permute.xlu2 %1101 }
0x16a5   :  { %v1104_v8 = vmul.f32 %v1102_v6, %v1085_v57 }
0x16a7   :  { %1106 = vrot.lane.b32.xlu0 %v1104_v8, %s2034_s16 }
0x16af   :  { %751 = vrot.lane.b32.xlu0 %v749_v15, %s2033_s3 }
0x1719   :  { %v1107_v16 = vpop.permute.xlu0 %1106 }
0x171a   :  { %1669 = vmatmul.msk.f32.vlgmr.msra.gmra.mxu2 %vm224_vm6, %v1107_v16 }
0x1721   :  { %v752_v23 = vpop.permute.xlu0 %751 }
0x1722   :  { %v754_v24 = vadd.f32 %v752_v23, %v744_v25  ;;  %v1451_v23 = vld [vmem:[#allocation15 + $0x28] sm:$0xff]  ;;  %v1450_v25 = vld [vmem:[#allocation15 + $0x20] sm:$0xff] }
0x179d   :  { %v1131_v19 = vpop.f32.mrf.mxu2 }
0x179e   :  { %v1134_v21 = vadd.f32 %v1131_v19, %v891_v18  ;;  %v1453_v19 = vld [vmem:[#allocation15 + $0x38] sm:$0xff] }
0x179f   :  { %1478 = vmatpush.msra.mxu2 %v1453_v19 }
0x17a0   :  { %1788 = vtanh.f32 %v1134_v21  ;;  %v1670_v28 = vmul.f32 -1.442695, %v1134_v21  ;;  %v1452_v21 = vld [vmem:[#allocation15 + $0x30] sm:$0xff] }
0x17a1   :  { %1790 = vtanh.f32 %v754_v24  ;;  %1479 = vmatpush.msra.mxu2 %v1452_v21 }
0x17a2   :  { %1792 = vpow2.f32 %v1670_v28 }
0x17a3   :  { %1480 = vmatpush.msra.mxu2 %v1451_v23 }
0x17a5   :  { %1481 = vmatpush.msra.mxu2 %v1450_v25 }
0x17a6   :  { %v1789_v27 = vpop.eup %1788 }
0x17a7   :  { %1157 = vrot.lane.b32.xlu2 %v1789_v27, %s2033_s3  ;;  %v1791_v29 = vpop.eup %1790 }
0x17a8   :  { %v1793_v31 = vpop.eup %1792 }
0x17a9   :  { %v1138_v32 = vadd.f32 1.0, %v1793_v31 }
0x17ab   :  { %1794 = vrcp.f32 %v1138_v32  ;;  %v1150_v37 = vand.u32 2147483648, %v1138_v32  ;;  %vm1144_vm2 = vweird.f32 %v1138_v32  ;;  %v1148_v38 = vand.u32 2147483647, %v1138_v32 }
0x17ad   :  { %v1151_v44 = vor.u32 1.1754944e-38, %v1150_v37  ;;  %vm1149_vm4 = vcmp.eq.f32.partialorder %v1148_v38, 8.507059e+37 }
0x17af   :  { %757 = vrot.lane.b32.xlu2 %v1791_v29, %s2033_s3  ;;  %v896_v29 = vpop.f32.mrf.mxu1 }
0x17b0   :  { %v897_v28 = vadd.f32 %v2285_v48, %v896_v29 }
0x17b1   :  { %v1795_v33 = vpop.eup %1794 }
0x17b2   :  { %v1140_v34 = vmul.f32 %v1795_v33, %v1138_v32  ;;  %vm1145_vm1 = vweird.f32 %v1795_v33 }
0x17b3   :  { %vm1146_vm3 = vmor %vm1144_vm2, %vm1145_vm1 }
0x17b4   :  { %v1141_v35 = vsub.f32 1.0, %v1140_v34 }
0x17b6   :  { %v1142_v36 = vmul.f32 %v1795_v33, %v1141_v35 }
0x17b8   :  { %v1143_v20 = vadd.f32 %v1795_v33, %v1142_v36 }
0x17ba   :  { %v1147_v39 = vsel %vm1146_vm3, %v1795_v33, %v1143_v20  ;;  %v2356_v33 = vld [vmem:[%s2422_s8] ss:$0 sm:$0xff]  ;;  %s2035_s8 = smov [#allocation17]  }
0x17bb   :  { %v1152_v46 = vsel %vm1149_vm4, %v1151_v44, %v1147_v39  ;;  %s1610_s22 = sshll.u32 %s2035_s8, 4  ;;  %s1611_s22 = int_to_ptr.vmem [resolvable:$true] %s1610_s22 }
0x17bc   :  { %v1155_v51 = vmul.f32 %v1152_v46, %v2312_v22 }
0x1801   :  { %v1158_v45 = vpop.permute.xlu2 %1157 }
0x1802   :  { %v1160_v49 = vmul.f32 %v1158_v45, %v1152_v46 }
0x1804   :  { %1162 = vrot.lane.b32.xlu1 %v1160_v49, %s2033_s3 }
0x1809   :  { %v758_v14 = vpop.permute.xlu2 %757 }
0x180a   :  { %v760_v50 = vmul.f32 %v758_v14, %v741_v13 }
0x180c   :  { %762 = vrot.lane.b32.xlu1 %v760_v50, %s2034_s16  ;;  %v1519_v50 = vlaneseq }
0x1876   :  { %v1163_v52 = vpop.permute.xlu1 %1162 }
0x1877   :  { %v1165_v40 = vadd.f32 %v1163_v52, %v1155_v51 }
0x1879   :  { %1796 = vtanh.f32 %v1165_v40 }
0x187e   :  { %v763_v41 = vpop.permute.xlu1 %762 }
0x187f   :  { %v1797_v53 = vpop.eup %1796  ;;  %766 = vst.msk [vmem:[#allocation3 + $0x38] sm:$0xff] %vm224_vm6, %v763_v41 }
0x1880   :  { %1168 = vrot.lane.b32.xlu0 %v1797_v53, %s2033_s3  ;;  %v2361_v53 = vand.u32 127, %v1519_v50 }
0x1882   :  { %vm1521_vm12 = vcmp.lt.s32.totalorder %v2361_v53, 2 }
0x1886   :  { %v770_v42 = vld [vmem:[#allocation3 + $0x38] sm:$0xff] }
0x1887   :  { %1655 = vmatmul.msk.f32.gmra.mxu3 %vm224_vm6, %v770_v42  ;;  %1663 = vmatmul.msk.f32.gmra.mxu1 %vm224_vm6, %v770_v42 }
0x18f2   :  { %v1169_v54 = vpop.permute.xlu0 %1168 }
0x18f3   :  { %v1171_v43 = vmul.f32 %v1169_v54, %v1152_v46 }
0x18f5   :  { %1173 = vrot.lane.b32.xlu2 %v1171_v43, %s2034_s16 }
0x190a   :  { %v2339_v57 = vpop.f32.mrf.mxu3 }
0x194f   :  { %v1174_v55 = vpop.permute.xlu2 %1173 }
0x1950   :  { %1671 = vmatmul.msk.f32.vlgmr.msrb.gmra.mxu3 %vm224_vm6, %v1174_v55 }
0x1951   :  { %1683 = vmatpush.msrb.mxu3 %v1453_v19 }
0x1953   :  { %1684 = vmatpush.msrb.mxu3 %v1452_v21 }
0x1955   :  { %1685 = vmatpush.msrb.mxu3 %v1451_v23 }
0x1957   :  { %1686 = vmatpush.msrb.mxu3 %v1450_v25 }
0x19d3   :  { %v1198_v60 = vpop.f32.mrf.mxu3 }
0x19d4   :  { %v1201_v61 = vadd.f32 %v1198_v60, %v894_v59 }
0x19d6   :  { %1798 = vtanh.f32 %v1201_v61  ;;  %v1672_v62 = vmul.f32 -1.442695, %v1201_v61 }
0x19d8   :  { %1800 = vpow2.f32 %v1672_v62 }
0x19dc   :  { %v1799_v22 = vpop.eup %1798 }
0x19dd   :  { %1224 = vrot.lane.b32.xlu0 %v1799_v22, %s2033_s3 }
0x19de   :  { %v1801_v63 = vpop.eup %1800 }
0x19df   :  { %v1205_v0 = vadd.f32 1.0, %v1801_v63 }
0x19e1   :  { %1802 = vrcp.f32 %v1205_v0  ;;  %v1217_v6 = vand.u32 2147483648, %v1205_v0  ;;  %vm1211_vm7 = vweird.f32 %v1205_v0  ;;  %v1215_v7 = vand.u32 2147483647, %v1205_v0 }
0x19e3   :  { %v1218_v9 = vor.u32 1.1754944e-38, %v1217_v6  ;;  %vm1216_vm9 = vcmp.eq.f32.partialorder %v1215_v7, 8.507059e+37 }
0x19e7   :  { %v1803_v1 = vpop.eup %1802 }
0x19e8   :  { %v1207_v2 = vmul.f32 %v1803_v1, %v1205_v0  ;;  %vm1212_vm5 = vweird.f32 %v1803_v1 }
0x19e9   :  { %vm1213_vm8 = vmor %vm1211_vm7, %vm1212_vm5 }
0x19ea   :  { %v1208_v3 = vsub.f32 1.0, %v1207_v2 }
0x19ec   :  { %v1209_v4 = vmul.f32 %v1803_v1, %v1208_v3 }
0x19ee   :  { %v1210_v5 = vadd.f32 %v1803_v1, %v1209_v4 }
0x19f0   :  { %v1214_v8 = vsel %vm1213_vm8, %v1803_v1, %v1210_v5 }
0x19f1   :  { %v1219_v11 = vsel %vm1216_vm9, %v1218_v9, %v1214_v8 }
0x19f2   :  { %v1222_v12 = vmul.f32 %v1219_v11, %v1165_v40 }
0x1a4f   :  { %v1225_v10 = vpop.permute.xlu0 %1224 }
0x1a50   :  { %v1227_v47 = vmul.f32 %v1225_v10, %v1219_v11 }
0x1a52   :  { %1229 = vrot.lane.b32.xlu1 %v1227_v47, %s2033_s3 }
0x1ac4   :  { %v1230_v13 = vpop.permute.xlu1 %1229 }
0x1ac5   :  { %v2344_v15 = vadd.f32 %v1230_v13, %v1222_v12 }
0x1ac7   :  { %1804 = vtanh.f32 %v2344_v15 }
0x1acd   :  { %v1805_v16 = vpop.eup %1804 }
0x1ace   :  { %1235 = vrot.lane.b32.xlu2 %v1805_v16, %s2033_s3 }
0x1b28   :  { %v1236_v17 = vpop.permute.xlu2 %1235 }
0x1b29   :  { %v1238_v18 = vmul.f32 %v1236_v17, %v1219_v11 }
0x1b2b   :  { %1240 = vrot.lane.b32.xlu0 %v1238_v18, %s2034_s16 }
0x1b9d   :  { %v1241_v24 = vpop.permute.xlu0 %1240 }
0x1b9e   :  { %1244 = vst.msk [vmem:[#allocation4 + $0x20] sm:$0xff] %vm224_vm6, %v1241_v24  ;;  %1673 = vmatmul.msk.f32.vlgmr.msrb.gmra.mxu2 %vm224_vm6, %v1241_v24 }
0x1ba5   :  { %v1446_v27 = vld [vmem:[#allocation4 + $0x20] sm:$0xff] }
0x1ba6   :  { %1679 = vmatmul.msk.f32.vlgmr.msra.gmra.mxu2 %vm224_vm6, %v1446_v27 }
0x1c21   :  { %v1265_v31 = vpop.f32.mrf.mxu2 }
0x1c22   :  { %v1268_v32 = vadd.f32 %v1265_v31, %v897_v28 }
0x1c24   :  { %1806 = vtanh.f32 %v1268_v32  ;;  %v1674_v58 = vmul.f32 -1.442695, %v1268_v32 }
0x1c29   :  { %v1483_v34 = vpop.f32.mrf.mxu2 }
0x1c2a   :  { %v1807_v35 = vpop.eup %1806  ;;  %v1499_v36 = vadd.f32 %v1483_v34, %v2333_v30 }
0x1c2b   :  { %1291 = vrot.lane.b32.xlu1 %v1807_v35, %s2033_s3 }
0x1c2c   :  { %v1515_v20 = vadd.f32 %v2356_v33, %v1499_v36 }
0x1c2e   :  { %v1534_v37 = vand.u32 2147483647, %v1515_v20  ;;  %v1522_v41 = vmax.f32 %v1515_v20, 0.0  ;;  %vm1526_vm11 = vcmp.ne.f32.partialorder %v1515_v20, %v1515_v20 }
0x1c30   :  { %v1538_v38 = vsub.f32 0.0, %v1534_v37 }
0x1c32   :  { %v1542_v39 = vmul.f32 1.442695, %v1538_v38 }
0x1c34   :  { %1808 = vpow2.f32 %v1542_v39 }
0x1c3a   :  { %v1809_v44 = vpop.eup %1808 }
0x1c3b   :  { %v1550_v45 = vadd.f32 1.0, %v1809_v44  ;;  %v1553_v46 = vmul.f32 -0.5, %v1809_v44  ;;  %v1556_v14 = vand.u32 2147483647, %v1809_v44 }
0x1c3d   :  { %1810 = vlog2.f32 %v1550_v45  ;;  %v1554_v49 = vadd.f32 1.0, %v1553_v46  ;;  %vm1557_vm10 = vcmp.lt.f32.partialorder %v1556_v14, 0.0004427343 }
0x1c3e   :  { %1812 = vpow2.f32 %v1674_v58 }
0x1c3f   :  { %v1555_v40 = vmul.f32 %v1809_v44, %v1554_v49 }
0x1c43   :  { %v1811_v51 = vpop.eup %1810 }
0x1c44   :  { %v1552_v52 = vmul.f32 0.6931472, %v1811_v51  ;;  %v1813_v59 = vpop.eup %1812 }
0x1c45   :  { %v1272_v60 = vadd.f32 1.0, %v1813_v59 }
0x1c46   :  { %v1558_v42 = vsel %vm1557_vm10, %v1555_v40, %v1552_v52 }
0x1c47   :  { %v1586_v54 = vadd.f32 %v1558_v42, %v1522_v41  ;;  %1814 = vrcp.f32 %v1272_v60  ;;  %v1284_v1 = vand.u32 2147483648, %v1272_v60  ;;  %vm1278_vm14 = vweird.f32 %v1272_v60 }
0x1c48   :  { %v1282_v2 = vand.u32 2147483647, %v1272_v60 }
0x1c49   :  { %v1590_v43 = vsel %vm1526_vm11, %v1515_v20, %v1586_v54  ;;  %v1285_v4 = vor.u32 1.1754944e-38, %v1284_v1 }
0x1c4a   :  { %v1594_v55 = vadd.f32 1e-06, %v1590_v43  ;;  %vm1283_vm0 = vcmp.eq.f32.partialorder %v1282_v2, 8.507059e+37 }
0x1c4c   :  { %v1598_v30 = vsel %vm1521_vm12, %v1515_v20, %v1594_v55 }
0x1c4d   :  { %1602 = vst [vmem:[#allocation17] sm:$0xff] %v1598_v30  ;;  %v1815_v61 = vpop.eup %1814 }
0x1c4e   :  { %v1274_v22 = vmul.f32 %v1815_v61, %v1272_v60  ;;  %vm1279_vm13 = vweird.f32 %v1815_v61 }
0x1c4f   :  { %vm1280_vm15 = vmor %vm1278_vm14, %vm1279_vm13 }
0x1c50   :  { %v1275_v62 = vsub.f32 1.0, %v1274_v22 }
0x1c52   :  { %v1276_v63 = vmul.f32 %v1815_v61, %v1275_v62 }
0x1c54   :  { %v1277_v0 = vadd.f32 %v1815_v61, %v1276_v63 }
0x1c56   :  { %v1281_v3 = vsel %vm1280_vm15, %v1815_v61, %v1277_v0 }
0x1c57   :  { %v1286_v6 = vsel %vm1283_vm0, %v1285_v4, %v1281_v3 }
0x1c58   :  { %v1289_v8 = vmul.f32 %v1286_v6, %v2344_v15  ;;  %v899_v15 = vpop.f32.mrf.mxu1 }
0x1c59   :  { %v900_v17 = vadd.f32 %v2285_v48, %v899_v15 }
0x1c9d   :  { %v1292_v5 = vpop.permute.xlu1 %1291 }
0x1c9e   :  { %v1294_v7 = vmul.f32 %v1292_v5, %v1286_v6  ;;  %v902_v5 = vpop.f32.mrf.mxu1 }
0x1ca0   :  { %1296 = vrot.lane.b32.xlu2 %v1294_v7, %s2033_s3 }
0x1cfa   :  { %v1297_v9 = vpop.permute.xlu2 %1296 }
0x1cfb   :  { %v2368_v10 = vadd.f32 %v1297_v9, %v1289_v8 }
0x1cfd   :  { %1816 = vtanh.f32 %v2368_v10 }
0x1d03   :  { %v1817_v11 = vpop.eup %1816 }
0x1d04   :  { %1302 = vrot.lane.b32.xlu0 %v1817_v11, %s2033_s3 }
0x1d76   :  { %v1303_v47 = vpop.permute.xlu0 %1302 }
0x1d77   :  { %v1305_v12 = vmul.f32 %v1303_v47, %v1286_v6  ;;  %v903_v6 = vadd.f32 %v2285_v48, %v902_v5 }
0x1d79   :  { %1307 = vrot.lane.b32.xlu1 %v1305_v12, %s2034_s16 }
0x1deb   :  { %v1308_v13 = vpop.permute.xlu1 %1307 }
0x1dec   :  { %1311 = vst.msk [vmem:[#allocation4 + $0x28] sm:$0xff] %vm224_vm6, %v1308_v13  ;;  %1675 = vmatmul.msk.f32.vlgmr.msra.gmra.mxu3 %vm224_vm6, %v1308_v13 }
0x1df3   :  { %v1447_v16 = vld [vmem:[#allocation4 + $0x28] sm:$0xff] }
0x1df4   :  { %1680 = vmatmul.msk.f32.gmra.mxu2 %vm224_vm6, %v1447_v16 }
0x1e6f   :  { %v1332_v18 = vpop.f32.mrf.mxu3 }
0x1e70   :  { %v1335_v19 = vadd.f32 %v1332_v18, %v900_v17 }
0x1e72   :  { %1818 = vtanh.f32 %v1335_v19  ;;  %v1676_v14 = vmul.f32 -1.442695, %v1335_v19 }
0x1e77   :  { %v1486_v21 = vpop.f32.mrf.mxu2 }
0x1e78   :  { %v1819_v23 = vpop.eup %1818  ;;  %v1500_v25 = vadd.f32 %v1486_v21, %v2335_v56 }
0x1e79   :  { %1358 = vrot.lane.b32.xlu2 %v1819_v23, %s2033_s3 }
0x1e7a   :  { %v1516_v24 = vadd.f32 %v2356_v33, %v1500_v25 }
0x1e7c   :  { %v1535_v27 = vand.u32 2147483647, %v1516_v24  ;;  %v1523_v39 = vmax.f32 %v1516_v24, 0.0  ;;  %vm1527_vm2 = vcmp.ne.f32.partialorder %v1516_v24, %v1516_v24 }
0x1e7e   :  { %v1539_v29 = vsub.f32 0.0, %v1535_v27 }
0x1e80   :  { %v1544_v28 = vmul.f32 1.442695, %v1539_v29 }
0x1e82   :  { %1820 = vpow2.f32 %v1544_v28 }
0x1e88   :  { %v1821_v31 = vpop.eup %1820 }
0x1e89   :  { %v1559_v32 = vadd.f32 1.0, %v1821_v31  ;;  %v1562_v34 = vmul.f32 -0.5, %v1821_v31  ;;  %v1565_v36 = vand.u32 2147483647, %v1821_v31 }
0x1e8b   :  { %1822 = vlog2.f32 %v1559_v32  ;;  %v1563_v35 = vadd.f32 1.0, %v1562_v34  ;;  %vm1566_vm1 = vcmp.lt.f32.partialorder %v1565_v36, 0.0004427343 }
0x1e8c   :  { %1824 = vpow2.f32 %v1676_v14 }
0x1e8d   :  { %v1564_v38 = vmul.f32 %v1821_v31, %v1563_v35 }
0x1e91   :  { %v1823_v20 = vpop.eup %1822 }
0x1e92   :  { %v1561_v37 = vmul.f32 0.6931472, %v1823_v20  ;;  %v1825_v50 = vpop.eup %1824 }
0x1e93   :  { %v1339_v51 = vadd.f32 1.0, %v1825_v50 }
0x1e94   :  { %v1567_v56 = vsel %vm1566_vm1, %v1564_v38, %v1561_v37 }
0x1e95   :  { %v1587_v44 = vadd.f32 %v1567_v56, %v1523_v39  ;;  %1826 = vrcp.f32 %v1339_v51  ;;  %v1351_v43 = vand.u32 2147483648, %v1339_v51  ;;  %vm1345_vm4 = vweird.f32 %v1339_v51 }
0x1e96   :  { %v1349_v55 = vand.u32 2147483647, %v1339_v51 }
0x1e97   :  { %v1591_v45 = vsel %vm1527_vm2, %v1516_v24, %v1587_v44  ;;  %v1352_v58 = vor.u32 1.1754944e-38, %v1351_v43 }
0x1e98   :  { %v1595_v46 = vadd.f32 1e-06, %v1591_v45  ;;  %vm1350_vm7 = vcmp.eq.f32.partialorder %v1349_v55, 8.507059e+37 }
0x1e9a   :  { %v1599_v49 = vsel %vm1521_vm12, %v1516_v24, %v1595_v46 }
0x1e9b   :  { %1603 = vst [vmem:[#allocation17 + $0x8] sm:$0xff] %v1599_v49  ;;  %v1827_v52 = vpop.eup %1826 }
0x1e9c   :  { %v1341_v40 = vmul.f32 %v1827_v52, %v1339_v51  ;;  %vm1346_vm3 = vweird.f32 %v1827_v52 }
0x1e9d   :  { %vm1347_vm5 = vmor %vm1345_vm4, %vm1346_vm3 }
0x1e9e   :  { %v1342_v41 = vsub.f32 1.0, %v1341_v40 }
0x1ea0   :  { %v1343_v42 = vmul.f32 %v1827_v52, %v1342_v41 }
0x1ea2   :  { %v1344_v54 = vadd.f32 %v1827_v52, %v1343_v42 }
0x1ea4   :  { %v1348_v30 = vsel %vm1347_vm5, %v1827_v52, %v1344_v54 }
0x1ea5   :  { %v1353_v60 = vsel %vm1350_vm7, %v1352_v58, %v1348_v30 }
0x1ea6   :  { %v1356_v22 = vmul.f32 %v1353_v60, %v2368_v10 }
0x1ed3   :  { %v1359_v59 = vpop.permute.xlu2 %1358 }
0x1ed4   :  { %v1361_v61 = vmul.f32 %v1359_v59, %v1353_v60 }
0x1ed6   :  { %1363 = vrot.lane.b32.xlu0 %v1361_v61, %s2033_s3 }
0x1f48   :  { %v1364_v62 = vpop.permute.xlu0 %1363 }
0x1f49   :  { %v2384_v63 = vadd.f32 %v1364_v62, %v1356_v22 }
0x1f4b   :  { %1828 = vtanh.f32 %v2384_v63 }
0x1f51   :  { %v1829_v0 = vpop.eup %1828 }
0x1f52   :  { %1369 = vrot.lane.b32.xlu1 %v1829_v0, %s2033_s3 }
0x1fc4   :  { %v1370_v1 = vpop.permute.xlu1 %1369 }
0x1fc5   :  { %v1372_v2 = vmul.f32 %v1370_v1, %v1353_v60 }
0x1fc7   :  { %1374 = vrot.lane.b32.xlu2 %v1372_v2, %s2034_s16 }
0x2021   :  { %v1375_v3 = vpop.permute.xlu2 %1374 }
0x2022   :  { %1378 = vst.msk [vmem:[#allocation4 + $0x30] sm:$0xff] %vm224_vm6, %v1375_v3  ;;  %1677 = vmatmul.msk.f32.vlgmr.msra.gmra.mxu0 %vm224_vm6, %v1375_v3 }
0x2029   :  { %v1448_v4 = vld [vmem:[#allocation4 + $0x30] sm:$0xff] }
0x202a   :  { %1681 = vmatmul.msk.f32.vlgmr.msrb.gmra.mxu3 %vm224_vm6, %v1448_v4 }
0x209f   :  { %v1399_v7 = vpop.f32.mrf.mxu0 }
0x20a0   :  { %v1402_v8 = vadd.f32 %v1399_v7, %v903_v6 }
0x20a2   :  { %1830 = vtanh.f32 %v1402_v8  ;;  %v1678_v32 = vmul.f32 -1.442695, %v1402_v8 }
0x20a8   :  { %v1831_v9 = vpop.eup %1830 }
0x20a9   :  { %1425 = vrot.lane.b32.xlu0 %v1831_v9, %s2033_s3 }
0x20ad   :  { %v1489_v10 = vpop.f32.mrf.mxu3 }
0x20ae   :  { %v1501_v11 = vadd.f32 %v1489_v10, %v2337_v26 }
0x20b0   :  { %v1517_v47 = vadd.f32 %v2356_v33, %v1501_v11 }
0x20b2   :  { %v1536_v12 = vand.u32 2147483647, %v1517_v47  ;;  %v1524_v24 = vmax.f32 %v1517_v47, 0.0  ;;  %vm1528_vm9 = vcmp.ne.f32.partialorder %v1517_v47, %v1517_v47 }
0x20b4   :  { %v1540_v13 = vsub.f32 0.0, %v1536_v12 }
0x20b6   :  { %v1546_v16 = vmul.f32 1.442695, %v1540_v13 }
0x20b8   :  { %1832 = vpow2.f32 %v1546_v16 }
0x20be   :  { %v1833_v15 = vpop.eup %1832 }
0x20bf   :  { %v1568_v17 = vadd.f32 1.0, %v1833_v15  ;;  %v1571_v18 = vmul.f32 -0.5, %v1833_v15  ;;  %v1574_v19 = vand.u32 2147483647, %v1833_v15 }
0x20c1   :  { %1834 = vlog2.f32 %v1568_v17  ;;  %v1572_v48 = vadd.f32 1.0, %v1571_v18  ;;  %vm1575_vm8 = vcmp.lt.f32.partialorder %v1574_v19, 0.0004427343 }
0x20c2   :  { %1836 = vpow2.f32 %v1678_v32 }
0x20c3   :  { %v1573_v25 = vmul.f32 %v1833_v15, %v1572_v48 }
0x20c7   :  { %v1835_v21 = vpop.eup %1834 }
0x20c8   :  { %v1570_v23 = vmul.f32 0.6931472, %v1835_v21  ;;  %v1837_v34 = vpop.eup %1836 }
0x20c9   :  { %v1406_v35 = vadd.f32 1.0, %v1837_v34 }
0x20ca   :  { %v1576_v27 = vsel %vm1575_vm8, %v1573_v25, %v1570_v23 }
0x20cb   :  { %v1588_v29 = vadd.f32 %v1576_v27, %v1524_v24  ;;  %1838 = vrcp.f32 %v1406_v35  ;;  %v1418_v56 = vand.u32 2147483648, %v1406_v35  ;;  %vm1412_vm11 = vweird.f32 %v1406_v35 }
0x20cc   :  { %v1416_v44 = vand.u32 2147483647, %v1406_v35 }
0x20cd   :  { %v1592_v26 = vsel %vm1528_vm9, %v1517_v47, %v1588_v29  ;;  %v1419_v46 = vor.u32 1.1754944e-38, %v1418_v56 }
0x20ce   :  { %v1596_v28 = vadd.f32 1e-06, %v1592_v26  ;;  %vm1417_vm14 = vcmp.eq.f32.partialorder %v1416_v44, 8.507059e+37 }
0x20d0   :  { %v1600_v31 = vsel %vm1521_vm12, %v1517_v47, %v1596_v28 }
0x20d1   :  { %1604 = vst [vmem:[#allocation17 + $0x10] sm:$0xff] %v1600_v31  ;;  %v1839_v36 = vpop.eup %1838 }
0x20d2   :  { %v1408_v20 = vmul.f32 %v1839_v36, %v1406_v35  ;;  %vm1413_vm10 = vweird.f32 %v1839_v36 }
0x20d3   :  { %vm1414_vm13 = vmor %vm1412_vm11, %vm1413_vm10 }
0x20d4   :  { %v1409_v37 = vsub.f32 1.0, %v1408_v20 }
0x20d6   :  { %v1410_v38 = vmul.f32 %v1839_v36, %v1409_v37 }
0x20d8   :  { %v1411_v39 = vadd.f32 %v1839_v36, %v1410_v38 }
0x20da   :  { %v1415_v45 = vsel %vm1414_vm13, %v1839_v36, %v1411_v39 }
0x20db   :  { %v1420_v14 = vsel %vm1417_vm14, %v1419_v46, %v1415_v45 }
0x20dc   :  { %v1423_v51 = vmul.f32 %v1420_v14, %v2384_v63 }
0x211b   :  { %v1426_v49 = vpop.permute.xlu0 %1425 }
0x211c   :  { %v1428_v50 = vmul.f32 %v1426_v49, %v1420_v14 }
0x211e   :  { %1430 = vrot.lane.b32.xlu1 %v1428_v50, %s2033_s3 }
0x2190   :  { %v1431_v52 = vpop.permute.xlu1 %1430 }
0x2191   :  { %v1433_v40 = vadd.f32 %v1431_v52, %v1423_v51 }
0x2193   :  { %1840 = vtanh.f32 %v1433_v40 }
0x2199   :  { %v1841_v41 = vpop.eup %1840 }
0x219a   :  { %1436 = vrot.lane.b32.xlu2 %v1841_v41, %s2033_s3 }
0x21f4   :  { %v1437_v42 = vpop.permute.xlu2 %1436 }
0x21f5   :  { %v1439_v54 = vmul.f32 %v1437_v42, %v1420_v14 }
0x21f7   :  { %1441 = vrot.lane.b32.xlu0 %v1439_v54, %s2034_s16 }
0x2269   :  { %v1442_v43 = vpop.permute.xlu0 %1441 }
0x226a   :  { %1445 = vst.msk [vmem:[#allocation4 + $0x38] sm:$0xff] %vm224_vm6, %v1442_v43 }
0x2271   :  { %v1449_v55 = vld [vmem:[#allocation4 + $0x38] sm:$0xff] }
0x2272   :  { %1682 = vmatmul.msk.f32.gmra.mxu3 %vm224_vm6, %v1449_v55 }
0x22f5   :  { %v1492_v30 = vpop.f32.mrf.mxu3 }
0x22f6   :  { %v1502_v58 = vadd.f32 %v1492_v30, %v2339_v57 }
0x22f8   :  { %v1518_v59 = vadd.f32 %v2356_v33, %v1502_v58 }
0x22fa   :  { %v1537_v60 = vand.u32 2147483647, %v1518_v59  ;;  %v1525_v6 = vmax.f32 %v1518_v59, 0.0  ;;  %vm1529_vm15 = vcmp.ne.f32.partialorder %v1518_v59, %v1518_v59 }
0x22fc   :  { %v1541_v61 = vsub.f32 0.0, %v1537_v60 }
0x22fe   :  { %v1548_v22 = vmul.f32 1.442695, %v1541_v61 }
0x2300   :  { %1842 = vpow2.f32 %v1548_v22 }
0x2306   :  { %v1843_v62 = vpop.eup %1842 }
0x2307   :  { %v1577_v63 = vadd.f32 1.0, %v1843_v62  ;;  %v1580_v0 = vmul.f32 -0.5, %v1843_v62  ;;  %v1583_v2 = vand.u32 2147483647, %v1843_v62 }
0x2309   :  { %1844 = vlog2.f32 %v1577_v63  ;;  %v1581_v1 = vadd.f32 1.0, %v1580_v0  ;;  %vm1584_vm6 = vcmp.lt.f32.partialorder %v1583_v2, 0.0004427343 }
0x230b   :  { %v1582_v5 = vmul.f32 %v1843_v62, %v1581_v1 }
0x230f   :  { %v1845_v3 = vpop.eup %1844 }
0x2310   :  { %v1579_v4 = vmul.f32 0.6931472, %v1845_v3 }
0x2312   :  { %v1585_v7 = vsel %vm1584_vm6, %v1582_v5, %v1579_v4 }
0x2313   :  { %v1589_v8 = vadd.f32 %v1585_v7, %v1525_v6 }
0x2315   :  { %v1593_v57 = vsel %vm1529_vm15, %v1518_v59, %v1589_v8 }
0x2316   :  { %v1597_v33 = vadd.f32 1e-06, %v1593_v57 }
0x2318   :  { %v1601_v9 = vsel %vm1521_vm12, %v1518_v59, %v1597_v33 }
0x2319   :  { %1605 = vst [vmem:[#allocation17 + $0x18] sm:$0xff] %v1601_v9 }
0x231a   :  { %1618 = dma.vmem_to_hbm [thread:$0]  %s1611_s22, 512, %s1613_s23, [#allocation8], %s2025_s17, %s2025_s17, %s2026_s18  }
0x231b   :  { %2022 = dma.done.wait [#allocation8], 512  }
0x231c   :  { %2023 = vsyncadd [#allocation8], 4294966784 }
0x231d   :  { %1623 = vsyncpa [#allocation7], 1 }
0x231e   :  { %1624 = vsyncpa [#allocation10], 1 }
0x231f   :  { %1625 = vsyncpa [#allocation13], 1 }
0x2320   :  { %1626 = vsyncpa [#allocation16], 1 }
0x2321   :  { %1627 = vsyncpa [#allocation8], 1 }

</bundles_post_ra>
